<compile_context>
chip_gen: v6e
topology: v6e:2x2x1
jax: 0.10.0
libtpu: 0.0.40
codegen_flags: <defaults>
</compile_context>

<pallas_src>
import functools

import jax
import jax.numpy as jnp
from jax import lax
from jax.experimental import pallas as pl
from jax.experimental.pallas import tpu as pltpu

ALPHA = 0.5
SIGMA = 0.5
EPS = 1e-7


def _round_up(x, m):
    return ((x + m - 1) // m) * m


# --------------------------------------------------------------------------------------
# Kernel 1: per-row pass (NLL partials + per-row rank factors).  O(n * T) work.
# --------------------------------------------------------------------------------------
def _row_kernel(phi_ref, idx_ref, ev_ref, valid_ref,
                e_out_ref, yw_out_ref, nll_out_ref, *, inv_sigma):
    phi = phi_ref[...]                 # (TM, mp) f32: logits + appended zero column
    idx = idx_ref[...]                 # (TM, 1)  i32 duration index
    ev = ev_ref[...]                   # (TM, 1)  f32 event indicator
    valid = valid_ref[...]             # (TM, 1)  f32, 0 for padded rows
    tm, mp = phi.shape

    # exact one-hot of the duration index (idx always in [0, mp), incl. padded rows)
    t_iota = lax.broadcasted_iota(jnp.int32, (tm, mp), 1)
    y = (t_iota == idx).astype(jnp.float32)

    # upper-triangular ones matrix (k <= t) generated in-kernel: ~1 vreg of VPU work
    r_iota = lax.broadcasted_iota(jnp.int32, (mp, mp), 0)
    c_iota = lax.broadcasted_iota(jnp.int32, (mp, mp), 1)
    tri = (r_iota <= c_iota).astype(jnp.float32)

    gamma = jnp.max(phi, axis=1, keepdims=True)
    e = jnp.exp(phi - gamma)
    cumsum = jnp.dot(e, tri, preferred_element_type=jnp.float32)   # cumsum over time (MXU)
    sum_ = cumsum[:, mp - 1:mp]                                    # last column == row sum
    inv_sum = pl.reciprocal(sum_, approx=False)                    # off the O(n^2) path

    phi_at = jnp.sum(phi * y, axis=1, keepdims=True)               # phi[i, idx[i]]
    cs_at = jnp.sum(cumsum * y, axis=1, keepdims=True)             # cumsum[i, idx[i]]

    # ---- NLL-PMF partial sum (raw; alpha/n applied in the wrapper), padded rows masked ----
    part1 = (phi_at - gamma) * ev
    part2 = -jnp.log(sum_ + EPS)
    part3 = jnp.log(jnp.maximum(sum_ - cs_at, 0.0) + EPS) * (1.0 - ev)
    nll_tile = jnp.sum(-(part1 + part2 + part3) * valid)

    # ---- per-row factors of the factorised rank term (valid_j and w_i folded in) ----
    e_out_ref[...] = valid * jnp.exp(cumsum * (inv_sum * inv_sigma))       # valid*exp(cdf/sigma)
    w = ev * valid * jnp.exp(-(cs_at * inv_sum) * inv_sigma)               # ev*valid*exp(-diag/s)
    yw_out_ref[...] = y * w                                                # pre-scaled one-hot
    nll_out_ref[...] = jnp.full(nll_out_ref.shape, nll_tile, jnp.float32)


# --------------------------------------------------------------------------------------
# Kernel 2: pairwise rank pass.  O(n^2) work: one MXU matmul + cmp/select/reduce on VPU.
# --------------------------------------------------------------------------------------
def _pair_kernel(yw_ref, idx_i_ref, key_j_ref, e_j_ref, out_ref, acc_ref):
    j = pl.program_id(1)
    nj = pl.num_programs(1)

    @pl.when(j == 0)
    def _():
        acc_ref[...] = jnp.zeros_like(acc_ref)

    yw = yw_ref[...]                   # (TI, mp) f32: one_hot(T_i) * w_i
    idx_i = idx_i_ref[...]             # (TI, 1)  i32
    key_j = key_j_ref[...]             # (1, TJ)  i32: idx_j + (1 - ev_j)
    e_j = e_j_ref[...]                 # (TJ, mp) f32: valid_j * exp(cdf_j/sigma)

    # (yw @ E_j^T)[a,b] == w_a * valid_b * exp(cdf_b[idx_a]/sigma)   (one MXU matmul)
    rt = lax.dot_general(yw, e_j, (((1,), (1,)), ((), ())),
                         preferred_element_type=jnp.float32)        # (TI, TJ)

    # rank condition collapsed to a single compare: idx_i < idx_j + (1 - ev_j)
    tile = jnp.where(idx_i < key_j, rt, 0.0)
    acc_ref[...] = acc_ref[...] + jnp.sum(tile)                     # raw sum, 1-vreg scratch

    @pl.when(j == nj - 1)
    def _():
        out_ref[...] = acc_ref[...]


# --------------------------------------------------------------------------------------
# Wrapper
# --------------------------------------------------------------------------------------
def deephit_surv_loss(logits, label, event):
    """logits: (N, T) float, label: (N,) int duration index, event: (N,) {0,1}."""
    n, m = logits.shape
    mp = m + 1                                    # pad_col: appended zero column

    # ---- tile-size selection (all multiples of 128; 256/1024 for large batches) ----
    n128 = _round_up(max(n, 1), 128)
    if n128 <= 1024:
        n_pad = n128
        tj = n_pad
        if n_pad <= 256:
            ti = n_pad
        elif n_pad % 256 == 0:
            ti = 256
        else:
            ti = 128
    else:
        n_pad = _round_up(n, 1024)
        ti, tj = 256, 1024
    row_tile = min(n_pad, 1024)

    # ---- padded inputs (padded rows: valid=0, event=0, idx=0) ----
    phi = jnp.zeros((n_pad, mp), jnp.float32).at[:n, :m].set(logits.astype(jnp.float32))
    idx = jnp.zeros((n_pad,), jnp.int32).at[:n].set(label.astype(jnp.int32))
    ev = jnp.zeros((n_pad,), jnp.float32).at[:n].set(event.astype(jnp.float32))
    valid = jnp.zeros((n_pad,), jnp.float32).at[:n].set(1.0)
    ev_i32 = jnp.zeros((n_pad,), jnp.int32).at[:n].set(event.astype(jnp.int32))
    key = idx + (1 - ev_i32)                       # idx_j + (1 - ev_j): folds the rank condition

    idx_col, ev_col, valid_col = idx[:, None], ev[:, None], valid[:, None]
    key_row = key[None, :]

    # -------- pass 1: per-row quantities --------
    ni_row = n_pad // row_tile
    e_cdf, yw, nll_part = pl.pallas_call(
        functools.partial(_row_kernel, inv_sigma=1.0 / SIGMA),
        out_shape=(jax.ShapeDtypeStruct((n_pad, mp), jnp.float32),
                   jax.ShapeDtypeStruct((n_pad, mp), jnp.float32),
                   jax.ShapeDtypeStruct((ni_row, 8, 128), jnp.float32)),
        grid_spec=pltpu.PrefetchScalarGridSpec(
            num_scalar_prefetch=0,
            grid=(ni_row,),
            in_specs=[pl.BlockSpec((row_tile, mp), lambda i: (i, 0)),   # phi
                      pl.BlockSpec((row_tile, 1), lambda i: (i, 0)),    # idx
                      pl.BlockSpec((row_tile, 1), lambda i: (i, 0)),    # event
                      pl.BlockSpec((row_tile, 1), lambda i: (i, 0))],   # valid
            out_specs=[pl.BlockSpec((row_tile, mp), lambda i: (i, 0)),  # E
                       pl.BlockSpec((row_tile, mp), lambda i: (i, 0)),  # YW
                       pl.BlockSpec((1, 8, 128), lambda i: (i, 0, 0))]),  # nll partials
        compiler_params=pltpu.CompilerParams(dimension_semantics=("parallel",)),
    )(phi, idx_col, ev_col, valid_col)

    # -------- pass 2: tiled pairwise rank term --------
    ni = n_pad // ti
    nj = n_pad // tj
    rank_part = pl.pallas_call(
        _pair_kernel,
        out_shape=jax.ShapeDtypeStruct((ni, 8, 128), jnp.float32),
        grid_spec=pltpu.PrefetchScalarGridSpec(
            num_scalar_prefetch=0,
            grid=(ni, nj),
            in_specs=[pl.BlockSpec((ti, mp), lambda i, j: (i, 0)),      # YW_i
                      pl.BlockSpec((ti, 1), lambda i, j: (i, 0)),       # idx_i
                      pl.BlockSpec((1, tj), lambda i, j: (0, j)),       # key_j
                      pl.BlockSpec((tj, mp), lambda i, j: (j, 0))],     # E_j
            out_specs=pl.BlockSpec((1, 8, 128), lambda i, j: (i, 0, 0)),
            scratch_shapes=[pltpu.VMEM((1, 8, 128), jnp.float32)]),
        compiler_params=pltpu.CompilerParams(
            dimension_semantics=("parallel", "arbitrary")),
    )(yw, idx_col, key_row, e_cdf)

    # partials are raw sums; apply the normalisers once here (true n, not n_pad)
    nll = (ALPHA / float(n)) * jnp.sum(nll_part[:, 0, 0])
    rank = ((1.0 - ALPHA) / float(n * n)) * jnp.sum(rank_part[:, 0, 0])
    return nll + rank


# --------------------------------------------------------------------------------------
# Pure-JAX reference (mirrors pycox DeepHitSingleLoss(alpha=0.5, sigma=0.5))
# --------------------------------------------------------------------------------------
def _reference_loss(logits, label, event):
    n, m = logits.shape
    phi = jnp.concatenate([logits.astype(jnp.float32),
                           jnp.zeros((n, 1), jnp.float32)], axis=1)
    idx = label.astype(jnp.int32)
    ev = event.astype(jnp.float32)
    gamma = jnp.max(phi, axis=1)
    cumsum = jnp.cumsum(jnp.exp(phi - gamma[:, None]), axis=1)
    sum_ = cumsum[:, -1]
    part1 = (phi[jnp.arange(n), idx] - gamma) * ev
    part2 = -jnp.log(jnp.maximum(sum_, 0.0) + EPS)
    part3 = jnp.log(jnp.maximum(sum_ - cumsum[jnp.arange(n), idx], 0.0) + EPS) * (1.0 - ev)
    nll = jnp.mean(-(part1 + part2 + part3))

    pmf = jax.nn.softmax(phi, axis=1)
    y = jax.nn.one_hot(idx, m + 1, dtype=jnp.float32)
    r = jnp.cumsum(pmf, axis=1) @ y.T
    diag_r = jnp.diag(r)
    R = (diag_r[None, :] - r).T
    dur_i, dur_j = idx[:, None], idx[None, :]
    ev_i, ev_j = ev[:, None], ev[None, :]
    rank_mat = ((dur_i < dur_j) | ((dur_i == dur_j) & (ev_j == 0))).astype(jnp.float32) * ev_i
    rank_loss = jnp.mean(jnp.mean(rank_mat * jnp.exp(-R / SIGMA), axis=1, keepdims=True))
    return ALPHA * nll + (1.0 - ALPHA) * rank_loss


if __name__ == "__main__":
    key = jax.random.PRNGKey(0)
    k1, k2, k3 = jax.random.split(key, 3)

    # small shapes consistent with the module: batch of 8 samples, 10 duration bins
    N, T = 8, 10
    logits = jax.random.normal(k1, (N, T), dtype=jnp.float32)
    label = jax.random.randint(k2, (N,), 0, T, dtype=jnp.int32)
    event = jax.random.bernoulli(k3, 0.6, (N,)).astype(jnp.float32)

    loss = jax.block_until_ready(deephit_surv_loss(logits, label, event))
    ref = jax.block_until_ready(_reference_loss(logits, label, event))
    assert jnp.isfinite(loss), "kernel produced non-finite loss"
    assert jnp.allclose(loss, ref, rtol=1e-3, atol=1e-3), (loss, ref)

    # multi-i-tile + padded-batch path (n_pad=384, ti=128, tj=384)
    N2 = 300
    logits2 = jax.random.normal(k1, (N2, T), dtype=jnp.float32)
    label2 = jax.random.randint(k2, (N2,), 0, T, dtype=jnp.int32)
    event2 = jax.random.bernoulli(k3, 0.6, (N2,)).astype(jnp.float32)
    loss2 = jax.block_until_ready(deephit_surv_loss(logits2, label2, event2))
    ref2 = jax.block_until_ready(_reference_loss(logits2, label2, event2))
    assert jnp.allclose(loss2, ref2, rtol=1e-3, atol=1e-3), (loss2, ref2)

    # large-batch path with decoupled 256x1024 tiles and multi-j accumulation (n_pad=2048)
    N3 = 1400
    logits3 = jax.random.normal(k1, (N3, T), dtype=jnp.float32)
    label3 = jax.random.randint(k2, (N3,), 0, T, dtype=jnp.int32)
    event3 = jax.random.bernoulli(k3, 0.6, (N3,)).astype(jnp.float32)
    loss3 = jax.block_until_ready(deephit_surv_loss(logits3, label3, event3))
    ref3 = jax.block_until_ready(_reference_loss(logits3, label3, event3))
    assert jnp.allclose(loss3, ref3, rtol=1e-3, atol=1e-3), (loss3, ref3)

    print("KERNEL_OK")
</pallas_src>

<mosaic_0001>
module attributes {stable_mosaic.version = 11 : i64} {
  func.func @_row_kernel(%arg0: i32, %arg1: memref<128x11xf32, #tpu.memory_space<vmem>>, %arg2: memref<128x1xi32, #tpu.memory_space<vmem>>, %arg3: memref<128x1xf32, #tpu.memory_space<vmem>>, %arg4: memref<128x1xf32, #tpu.memory_space<vmem>>, %arg5: memref<128x11xf32, #tpu.memory_space<vmem>>, %arg6: memref<128x11xf32, #tpu.memory_space<vmem>>, %arg7: memref<1x8x128xf32, #tpu.memory_space<vmem>>) attributes {dimension_semantics = [#tpu.dimension_semantics<parallel>], iteration_bounds = array<i64: 1>, scalar_prefetch = 0 : i64, scratch_operands = 0 : i64, tpu.core_type = #tpu.core_type<tc>, window_params = [{transform_indices = @transform_0, window_bounds = array<i64: 128, 11>}, {transform_indices = @transform_1, window_bounds = array<i64: 128, 1>}, {transform_indices = @transform_2, window_bounds = array<i64: 128, 1>}, {transform_indices = @transform_3, window_bounds = array<i64: 128, 1>}, {transform_indices = @transform_4, window_bounds = array<i64: 128, 11>}, {transform_indices = @transform_5, window_bounds = array<i64: 128, 11>}, {transform_indices = @transform_6, window_bounds = array<i64: 1, 8, 128>}]} {
    %c0 = arith.constant 0 : index
    %c0_0 = arith.constant 0 : index
    %0 = vector.load %arg1[%c0, %c0_0] : memref<128x11xf32, #tpu.memory_space<vmem>>, vector<128x11xf32>
    %c0_1 = arith.constant 0 : index
    %c0_2 = arith.constant 0 : index
    %1 = vector.load %arg2[%c0_1, %c0_2] : memref<128x1xi32, #tpu.memory_space<vmem>>, vector<128x1xi32>
    %c0_3 = arith.constant 0 : index
    %c0_4 = arith.constant 0 : index
    %2 = vector.load %arg3[%c0_3, %c0_4] : memref<128x1xf32, #tpu.memory_space<vmem>>, vector<128x1xf32>
    %c0_5 = arith.constant 0 : index
    %c0_6 = arith.constant 0 : index
    %3 = vector.load %arg4[%c0_5, %c0_6] : memref<128x1xf32, #tpu.memory_space<vmem>>, vector<128x1xf32>
    %4 = tpu.iota {dimensions = array<i32: 1>} : vector<128x11xi32>
    %5 = vector.broadcast %1 : vector<128x1xi32> to vector<128x11xi32>
    %6 = arith.cmpi eq, %4, %5 : vector<128x11xi32>
    %7 = arith.extui %6 : vector<128x11xi1> to vector<128x11xi32>
    %8 = arith.sitofp %7 : vector<128x11xi32> to vector<128x11xf32>
    %9 = tpu.iota {dimensions = array<i32: 0>} : vector<11x11xi32>
    %10 = tpu.iota {dimensions = array<i32: 1>} : vector<11x11xi32>
    %11 = arith.cmpi sle, %9, %10 : vector<11x11xi32>
    %12 = arith.extui %11 : vector<11x11xi1> to vector<11x11xi32>
    %13 = arith.sitofp %12 : vector<11x11xi32> to vector<11x11xf32>
    %cst = arith.constant dense<0xFF800000> : vector<128xf32>
    %14 = vector.multi_reduction <maximumf>, %0, %cst [1] : vector<128x11xf32> to vector<128xf32>
    %15 = vector.shape_cast %14 : vector<128xf32> to vector<128x1xf32>
    %16 = vector.broadcast %15 : vector<128x1xf32> to vector<128x11xf32>
    %17 = arith.subf %0, %16 : vector<128x11xf32>
    %18 = math.exp %17 : vector<128x11xf32>
    %cst_7 = arith.constant dense<0.000000e+00> : vector<128x11xf32>
    %19 = tpu.matmul %18, %13, %cst_7 {dimension_numbers = #tpu.dot_dimension_numbers<[1], [0], [0], [1], [0, 0, 1, 1], [], []>} : vector<128x11xf32>, vector<11x11xf32>, vector<128x11xf32> -> vector<128x11xf32>
    %20 = vector.extract_strided_slice %19 {offsets = [0, 10], sizes = [128, 1], strides = [1, 1]} : vector<128x11xf32> to vector<128x1xf32>
    %21 = tpu.reciprocal %20 : vector<128x1xf32> -> vector<128x1xf32>
    %22 = arith.mulf %0, %8 : vector<128x11xf32>
    %cst_8 = arith.constant dense<0.000000e+00> : vector<128xf32>
    %23 = vector.multi_reduction <add>, %22, %cst_8 [1] : vector<128x11xf32> to vector<128xf32>
    %24 = vector.shape_cast %23 : vector<128xf32> to vector<128x1xf32>
    %25 = arith.mulf %19, %8 : vector<128x11xf32>
    %cst_9 = arith.constant dense<0.000000e+00> : vector<128xf32>
    %26 = vector.multi_reduction <add>, %25, %cst_9 [1] : vector<128x11xf32> to vector<128xf32>
    %27 = vector.shape_cast %26 : vector<128xf32> to vector<128x1xf32>
    %28 = arith.subf %24, %15 : vector<128x1xf32>
    %29 = arith.mulf %28, %2 : vector<128x1xf32>
    %cst_10 = arith.constant 1.000000e-07 : f32
    %30 = vector.broadcast %cst_10 : f32 to vector<128x1xf32>
    %31 = arith.addf %20, %30 : vector<128x1xf32>
    %32 = math.log %31 : vector<128x1xf32>
    %cst_11 = arith.constant 0.000000e+00 : f32
    %33 = vector.broadcast %cst_11 : f32 to vector<128x1xf32>
    %34 = arith.subf %33, %32 : vector<128x1xf32>
    %35 = arith.subf %20, %27 : vector<128x1xf32>
    %cst_12 = arith.constant 0.000000e+00 : f32
    %36 = vector.broadcast %cst_12 : f32 to vector<128x1xf32>
    %37 = arith.maximumf %35, %36 : vector<128x1xf32>
    %cst_13 = arith.constant 1.000000e-07 : f32
    %38 = vector.broadcast %cst_13 : f32 to vector<128x1xf32>
    %39 = arith.addf %37, %38 : vector<128x1xf32>
    %40 = math.log %39 : vector<128x1xf32>
    %cst_14 = arith.constant 1.000000e+00 : f32
    %41 = vector.broadcast %cst_14 : f32 to vector<128x1xf32>
    %42 = arith.subf %41, %2 : vector<128x1xf32>
    %43 = arith.mulf %40, %42 : vector<128x1xf32>
    %44 = arith.addf %29, %34 : vector<128x1xf32>
    %45 = arith.addf %44, %43 : vector<128x1xf32>
    %cst_15 = arith.constant 0.000000e+00 : f32
    %46 = vector.broadcast %cst_15 : f32 to vector<128x1xf32>
    %47 = arith.subf %46, %45 : vector<128x1xf32>
    %48 = arith.mulf %47, %3 : vector<128x1xf32>
    %49 = vector.shape_cast %48 : vector<128x1xf32> to vector<1x128x1xf32>
    %cst_16 = arith.constant dense<0.000000e+00> : vector<1xf32>
    %50 = vector.multi_reduction <add>, %49, %cst_16 [1, 2] : vector<1x128x1xf32> to vector<1xf32>
    %51 = vector.shape_cast %50 : vector<1xf32> to vector<1x1x1xf32>
    %52 = vector.extract %51[0, 0, 0] : f32 from vector<1x1x1xf32>
    %cst_17 = arith.constant 2.000000e+00 : f32
    %53 = vector.broadcast %cst_17 : f32 to vector<128x1xf32>
    %54 = arith.mulf %21, %53 : vector<128x1xf32>
    %55 = vector.broadcast %54 : vector<128x1xf32> to vector<128x11xf32>
    %56 = arith.mulf %19, %55 : vector<128x11xf32>
    %57 = math.exp %56 : vector<128x11xf32>
    %58 = vector.broadcast %3 : vector<128x1xf32> to vector<128x11xf32>
    %59 = arith.mulf %58, %57 : vector<128x11xf32>
    %c0_18 = arith.constant 0 : index
    %c0_19 = arith.constant 0 : index
    %60 = vector.load %arg5[%c0_18, %c0_19] : memref<128x11xf32, #tpu.memory_space<vmem>>, vector<128x11xf32>
    tpu.vector_store %arg5[%c0_18, %c0_19], %59 {strides = array<i32>} : memref<128x11xf32, #tpu.memory_space<vmem>>, vector<128x11xf32>,
    %61 = arith.mulf %2, %3 : vector<128x1xf32>
    %62 = arith.mulf %27, %21 : vector<128x1xf32>
    %cst_20 = arith.constant 0.000000e+00 : f32
    %63 = vector.broadcast %cst_20 : f32 to vector<128x1xf32>
    %64 = arith.subf %63, %62 : vector<128x1xf32>
    %cst_21 = arith.constant 2.000000e+00 : f32
    %65 = vector.broadcast %cst_21 : f32 to vector<128x1xf32>
    %66 = arith.mulf %64, %65 : vector<128x1xf32>
    %67 = math.exp %66 : vector<128x1xf32>
    %68 = arith.mulf %61, %67 : vector<128x1xf32>
    %69 = vector.broadcast %68 : vector<128x1xf32> to vector<128x11xf32>
    %70 = arith.mulf %8, %69 : vector<128x11xf32>
    %c0_22 = arith.constant 0 : index
    %c0_23 = arith.constant 0 : index
    %71 = vector.load %arg6[%c0_22, %c0_23] : memref<128x11xf32, #tpu.memory_space<vmem>>, vector<128x11xf32>
    tpu.vector_store %arg6[%c0_22, %c0_23], %70 {strides = array<i32>} : memref<128x11xf32, #tpu.memory_space<vmem>>, vector<128x11xf32>,
    %72 = vector.broadcast %52 : f32 to vector<1x8x128xf32>
    %c0_24 = arith.constant 0 : index
    %c0_25 = arith.constant 0 : index
    %c0_26 = arith.constant 0 : index
    %73 = vector.load %arg7[%c0_24, %c0_25, %c0_26] : memref<1x8x128xf32, #tpu.memory_space<vmem>>, vector<1x8x128xf32>
    tpu.vector_store %arg7[%c0_24, %c0_25, %c0_26], %72 {strides = array<i32>} : memref<1x8x128xf32, #tpu.memory_space<vmem>>, vector<1x8x128xf32>,
    return
  }
  func.func @transform_0(%arg0: i32) -> (i32, i32) {
    %c0_i32 = arith.constant 0 : i32
    %c0_i32_0 = arith.constant 0 : i32
    return %arg0, %c0_i32 : i32, i32
  }
  func.func @transform_1(%arg0: i32) -> (i32, i32) {
    %c0_i32 = arith.constant 0 : i32
    %c0_i32_0 = arith.constant 0 : i32
    return %arg0, %c0_i32 : i32, i32
  }
  func.func @transform_2(%arg0: i32) -> (i32, i32) {
    %c0_i32 = arith.constant 0 : i32
    %c0_i32_0 = arith.constant 0 : i32
    return %arg0, %c0_i32 : i32, i32
  }
  func.func @transform_3(%arg0: i32) -> (i32, i32) {
    %c0_i32 = arith.constant 0 : i32
    %c0_i32_0 = arith.constant 0 : i32
    return %arg0, %c0_i32 : i32, i32
  }
  func.func @transform_4(%arg0: i32) -> (i32, i32) {
    %c0_i32 = arith.constant 0 : i32
    %c0_i32_0 = arith.constant 0 : i32
    return %arg0, %c0_i32 : i32, i32
  }
  func.func @transform_5(%arg0: i32) -> (i32, i32) {
    %c0_i32 = arith.constant 0 : i32
    %c0_i32_0 = arith.constant 0 : i32
    return %arg0, %c0_i32 : i32, i32
  }
  func.func @transform_6(%arg0: i32) -> (i32, i32, i32) {
    %c0_i32 = arith.constant 0 : i32
    %c0_i32_0 = arith.constant 0 : i32
    %c0_i32_1 = arith.constant 0 : i32
    return %arg0, %c0_i32, %c0_i32_0 : i32, i32, i32
  }
}

</mosaic_0001>

<bundles_post_ra>
// kernel: tpu_custom_call.1
= control target key start
LH: loop header
LB: loop body
LE: loop exit
PB: predicated region body
PF: predicated region fallthrough
CT: control target
= control target key end

     0   :  { %vm192_vm0 = vcmask 89088   ;;  %v3399_v6 = vmov 0   ;;  %s3392_s0 = inlined_call_operand.vmem [shape: f32[128,11], index: 0, kind: input, shape index: {}]   ;;  %s3393_s1 = inlined_call_operand.vmem [shape: s32[128,1], index: 1, kind: input, shape index: {}]   ;;  %s3394_s2 = inlined_call_operand.vmem [shape: f32[128,1], index: 2, kind: input, shape index: {}]   ;;  %s3395_s3 = inlined_call_operand.vmem [shape: f32[128,1], index: 3, kind: input, shape index: {}]   ;;  %s3396_s4 = inlined_call_operand.vmem [shape: f32[128,11], index: 4, kind: output, shape index: {0}]   ;;  %s3397_s5 = inlined_call_operand.vmem [shape: f32[128,11], index: 5, kind: output, shape index: {1}]   ;;  %s3398_s6 = inlined_call_operand.hbm [shape: f32[1,8,128], index: 6, kind: output, shape index: {2}]  }
   0x1   :  { %v2079_v0 = vld [vmem:[%s3392_s0 + $0x10] sm:$0xff]  ;;  %v2084_v1 = vld [vmem:[%s3392_s0] sm:$0xff]  ;;  %v2089_v2 = vld [vmem:[%s3392_s0 + $0x18] sm:$0xff]  ;;  %1799 = vset.pattern.permute.xlu1 %v3399_v6  ;;  %1798 = vset.pattern.permute.xlu0 %v3399_v6 }
   0x2   :  { %v199_v3 = vsel %vm192_vm0, %v2079_v0, -inf  ;;  %v193_v4 = vsel %vm192_vm0, %v2084_v1, -inf  ;;  %v2098_v5 = vld [vmem:[%s3392_s0 + $0x8] sm:$0xff]  ;;  %v202_v7 = vsel %vm192_vm0, %v2089_v2, -inf  ;;  %v2114_v10 = vld [vmem:[%s3392_s0 + $0x20] sm:$0xff]  ;;  %v2123_v13 = vld [vmem:[%s3392_s0 + $0x38] sm:$0xff] }
   0x3   :  { %200 = vmax.xlane.f32.xlu1 %v199_v3  ;;  %194 = vmax.xlane.f32.xlu0 %v193_v4  ;;  %v196_v8 = vsel %vm192_vm0, %v2098_v5, -inf  ;;  %v2109_v9 = vld [vmem:[%s3392_s0 + $0x28] sm:$0xff]  ;;  %v205_v12 = vsel %vm192_vm0, %v2114_v10, -inf  ;;  %v2128_v14 = vld [vmem:[%s3392_s0 + $0x30] sm:$0xff] }
   0x4   :  { %v208_v11 = vsel %vm192_vm0, %v2109_v9, -inf }
   0x7   :  { %203 = vmax.xlane.f32.xlu1 %v202_v7  ;;  %197 = vmax.xlane.f32.xlu0 %v196_v8 }
   0xb   :  { %209 = vmax.xlane.f32.xlu1 %v208_v11  ;;  %206 = vmax.xlane.f32.xlu0 %v205_v12 }
   0xc   :  { %12 = vsyncpa [#allocation3], 0  ;;  %v214_v15 = vsel %vm192_vm0, %v2123_v13, -inf  ;;  %v211_v16 = vsel %vm192_vm0, %v2128_v14, -inf  ;;  %v2137_v17 = vld [vmem:[%s3392_s0 + $0x48] sm:$0xff]  ;;  %v2142_v18 = vld [vmem:[%s3392_s0 + $0x40] sm:$0xff]  ;;  %v85_v29 = vlaneseq }
   0xd   :  { %v220_v19 = vsel %vm192_vm0, %v2137_v17, -inf  ;;  %v217_v20 = vsel %vm192_vm0, %v2142_v18, -inf  ;;  %v2151_v21 = vld [vmem:[%s3392_s0 + $0x58] sm:$0xff]  ;;  %v2156_v22 = vld [vmem:[%s3392_s0 + $0x50] sm:$0xff]  ;;  %v2165_v25 = vld [vmem:[%s3392_s0 + $0x68] sm:$0xff]  ;;  %v2035_v37 = vmov 0.0  }
   0xe   :  { %v226_v23 = vsel %vm192_vm0, %v2151_v21, -inf  ;;  %v223_v24 = vsel %vm192_vm0, %v2156_v22, -inf  ;;  %v2170_v26 = vld [vmem:[%s3392_s0 + $0x60] sm:$0xff]  ;;  %v232_v27 = vsel %vm192_vm0, %v2165_v25, -inf  ;;  %v2179_v30 = vld [vmem:[%s3392_s0 + $0x78] sm:$0xff]  ;;  %v2184_v31 = vld [vmem:[%s3392_s0 + $0x70] sm:$0xff] }
   0xf   :  { %215 = vmax.xlane.f32.xlu1 %v214_v15  ;;  %212 = vmax.xlane.f32.xlu0 %v211_v16  ;;  %v229_v28 = vsel %vm192_vm0, %v2170_v26, -inf  ;;  %v184_v32 = vshrl.u32 %v85_v29, 7  ;;  %v238_v33 = vsel %vm192_vm0, %v2179_v30, -inf  ;;  %v235_v34 = vsel %vm192_vm0, %v2184_v31, -inf  ;;  %v38_v40 = vld [vmem:[%s3393_s1 + $0x8] sm:$0xff]  ;;  %v39_v41 = vld [vmem:[%s3393_s1 + $0x10] sm:$0xff] }
  0x10   :  { %v2190_v35 = vand.u32 127, %v85_v29  ;;  %vm337_vm2 = vcmask 1042432   ;;  %v2036_v39 = vmov 1.0   ;;  %v37_v42 = vld [vmem:[%s3393_s1] sm:$0xff]  ;;  %v40_v43 = vld [vmem:[%s3393_s1 + $0x18] sm:$0xff]  ;;  %v46_v44 = vld [vmem:[%s3393_s1 + $0x48] sm:$0xff] }
  0x11   :  { %v185_v36 = vadd.s32 8, %v184_v32  ;;  %v41_v45 = vld [vmem:[%s3393_s1 + $0x20] sm:$0xff]  ;;  %v48_v46 = vld [vmem:[%s3393_s1 + $0x58] sm:$0xff]  ;;  %v42_v47 = vld [vmem:[%s3393_s1 + $0x28] sm:$0xff]  ;;  %s2037_s16 = smov 10   ;;  %s2040_s10 = smov [#allocation2]  }
  0x12   :  { %vm186_vm3 = vcmp.le.s32.totalorder %v184_v32, %v2190_v35  ;;  %v50_v48 = vld [vmem:[%s3393_s1 + $0x68] sm:$0xff]  ;;  %v43_v49 = vld [vmem:[%s3393_s1 + $0x30] sm:$0xff]  ;;  %v52_v50 = vld [vmem:[%s3393_s1 + $0x78] sm:$0xff] }
  0x13   :  { %221 = vmax.xlane.f32.xlu1 %v220_v19  ;;  %218 = vmax.xlane.f32.xlu0 %v217_v20  ;;  %vm187_vm1 = vcmp.le.s32.totalorder %v185_v36, %v2190_v35  ;;  %v44_v51 = vld [vmem:[%s3393_s1 + $0x38] sm:$0xff]  ;;  %v45_v52 = vld [vmem:[%s3393_s1 + $0x40] sm:$0xff]  ;;  %v47_v53 = vld [vmem:[%s3393_s1 + $0x50] sm:$0xff] }
  0x14   :  { %v1720_v38 = vsel %vm187_vm1, 1.0, %v2035_v37  ;;  %v49_v54 = vld [vmem:[%s3393_s1 + $0x60] sm:$0xff]  ;;  %v51_v55 = vld [vmem:[%s3393_s1 + $0x70] sm:$0xff]  ;;  %s1691_s1 = sshll.u32 %s2040_s10, 4  ;;  %s1692_s1 = int_to_ptr.vmem [resolvable:$true] %s1691_s1 }
  0x15   :  { %1757 = vmatprep.subr.msk.mxu0 %vm337_vm2, %v1720_v38  ;;  %1785 = vmatprep.subr.msk.mxu1 %vm337_vm2, %v1720_v38  ;;  %s2012_s12 = scalar_lea.vmem %s1692_s1, 128  ;;  %p2017_p1 = scmp.lt.s32.totalorder %s1692_s1, %s1692_s1 }
  0x16   :  { %1758 = vmatpush3.msk.msra.mxu0 %vm337_vm2, %v1720_v38  ;;  %1787 = vmatpush3.msk.msra.mxu1 %vm337_vm2, %v1720_v38  ;;  %p2013_p0 = scmp.ne.s32.totalorder %s1692_s1, %s2012_s12  ;;  %p2018_p2 = scmp.lt.s32.totalorder %s2012_s12, %s2012_s12 }
  0x17   :  { %227 = vmax.xlane.f32.xlu1 %v226_v23  ;;  %224 = vmax.xlane.f32.xlu0 %v223_v24 }
  0x18   :  { %1759 = vmatprep.subr.msk.mxu0 %vm186_vm3, %v2036_v39  ;;  %1786 = vmatprep.subr.msk.mxu1 %vm186_vm3, %v2036_v39  ;;  %p2019_p3 = por %p2018_p2, %p2017_p1 }
  0x19   :  { %1760 = vmatpush3.msk.msra.mxu0 %vm186_vm3, %v2036_v39  ;;  %1788 = vmatpush3.msk.msra.mxu1 %vm186_vm3, %v2036_v39 }
  0x1a   :  { %p2020_p4 = pnand %p2019_p3, %p2013_p0 }
  0x1b   :  { %233 = vmax.xlane.f32.xlu1 %v232_v27  ;;  %230 = vmax.xlane.f32.xlu0 %v229_v28 }
  0x1f   :  { %239 = vmax.xlane.f32.xlu1 %v238_v33  ;;  %236 = vmax.xlane.f32.xlu0 %v235_v34 }
  0x30   :  { %91 = vperm.xlu1 %1799, %v38_v40  }
  0x34   :  { %94 = vperm.xlu1 %1799, %v39_v41  }
  0x35   :  { %88 = vperm.xlu0 %1798, %v37_v42  }
  0x38   :  { %97 = vperm.xlu1 %1799, %v40_v43  }
  0x39   :  { %115 = vperm.xlu0 %1798, %v46_v44  }
  0x3c   :  { %100 = vperm.xlu1 %1799, %v41_v45  }
  0x3d   :  { %121 = vperm.xlu0 %1798, %v48_v46  }
  0x40   :  { %103 = vperm.xlu1 %1799, %v42_v47  }
  0x41   :  { %127 = vperm.xlu0 %1798, %v50_v48  }
  0x44   :  { %106 = vperm.xlu1 %1799, %v43_v49  }
  0x45   :  { %133 = vperm.xlu0 %1798, %v52_v50  }
  0x48   :  { %109 = vperm.xlu1 %1799, %v44_v51  }
  0x4c   :  { %112 = vperm.xlu1 %1799, %v45_v52  }
  0x50   :  { %118 = vperm.xlu1 %1799, %v47_v53  }
  0x54   :  { %124 = vperm.xlu1 %1799, %v49_v54  }
  0x58   :  { %130 = vperm.xlu1 %1799, %v51_v55  }
  0x8c   :  { %v2243_v56 = vpop.xlane.xlu1 %200  ;;  %v2245_v57 = vpop.xlane.xlu0 %194 }
  0x8d   :  { %3447 = vst [vmem:[#allocation5_spill] sm:$0xff] %v2243_v56  ;;  %3448 = vst [vmem:[#allocation6_spill] sm:$0xff] %v2245_v57  ;;  %v241_v58 = vsub.f32 %v2084_v1, %v2245_v57  ;;  %v243_v59 = vsub.f32 %v2079_v0, %v2243_v56 }
  0x8f   :  { %v257_v60 = vmul.f32 1.442695, %v241_v58  ;;  %v261_v4 = vmul.f32 1.442695, %v243_v59 }
  0x90   :  { %v2251_v61 = vpop.xlane.xlu1 %203  ;;  %v2253_v62 = vpop.xlane.xlu0 %197 }
  0x91   :  { %3449 = vst [vmem:[#allocation7_spill] sm:$0xff] %v2251_v61  ;;  %3450 = vst [vmem:[#allocation8_spill] sm:$0xff] %v2253_v62  ;;  %v244_v63 = vsub.f32 %v2089_v2, %v2251_v61  ;;  %v242_v3 = vsub.f32 %v2098_v5, %v2253_v62  ;;  %1804 = vpow2.f32 %v257_v60 }
  0x93   :  { %v259_v7 = vmul.f32 1.442695, %v242_v3  ;;  %v263_v12 = vmul.f32 1.442695, %v244_v63 }
  0x94   :  { %v2259_v8 = vpop.xlane.xlu1 %209  ;;  %v2261_v11 = vpop.xlane.xlu0 %206 }
  0x95   :  { %3451 = vst [vmem:[#allocation9_spill] sm:$0xff] %v2259_v8  ;;  %3452 = vst [vmem:[#allocation10_spill] sm:$0xff] %v2261_v11  ;;  %v246_v15 = vsub.f32 %v2109_v9, %v2259_v8  ;;  %v245_v16 = vsub.f32 %v2114_v10, %v2261_v11  ;;  %1806 = vpow2.f32 %v259_v7 }
  0x96   :  { %1808 = vpow2.f32 %v261_v4 }
  0x97   :  { %v265_v19 = vmul.f32 1.442695, %v245_v16  ;;  %1810 = vpow2.f32 %v263_v12  ;;  %v267_v24 = vmul.f32 1.442695, %v246_v15 }
  0x98   :  { %v2267_v20 = vpop.xlane.xlu1 %215  ;;  %v2269_v23 = vpop.xlane.xlu0 %212 }
  0x99   :  { %3453 = vst [vmem:[#allocation11_spill] sm:$0xff] %v2267_v20  ;;  %3454 = vst [vmem:[#allocation12_spill] sm:$0xff] %v2269_v23  ;;  %v248_v27 = vsub.f32 %v2123_v13, %v2267_v20  ;;  %v247_v28 = vsub.f32 %v2128_v14, %v2269_v23  ;;  %1812 = vpow2.f32 %v265_v19 }
  0x9a   :  { %1814 = vpow2.f32 %v267_v24 }
  0x9b   :  { %v269_v29 = vmul.f32 1.442695, %v247_v28  ;;  %v271_v32 = vmul.f32 1.442695, %v248_v27 }
  0x9c   :  { %v2275_v33 = vpop.xlane.xlu1 %221  ;;  %v2277_v34 = vpop.xlane.xlu0 %218 }
  0x9d   :  { %3455 = vst [vmem:[#allocation13_spill] sm:$0xff] %v2275_v33  ;;  %3456 = vst [vmem:[#allocation14_spill] sm:$0xff] %v2277_v34  ;;  %v250_v36 = vsub.f32 %v2137_v17, %v2275_v33  ;;  %v249_v38 = vsub.f32 %v2142_v18, %v2277_v34  ;;  %1816 = vpow2.f32 %v269_v29 }
  0x9e   :  { %v1805_v39 = vpop.eup %1804  ;;  %1818 = vpow2.f32 %v271_v32 }
  0x9f   :  { %v275_v40 = vmul.f32 1.442695, %v250_v36  ;;  %v273_v41 = vmul.f32 1.442695, %v249_v38  ;;  %1761 = vmatprep.mubr.msk.f32.mxu0 %vm192_vm0, %v1805_v39 }
  0xa0   :  { %v2284_v42 = vpop.xlane.xlu1 %227  ;;  %v2286_v43 = vpop.xlane.xlu0 %224 }
  0xa1   :  { %3457 = vst [vmem:[#allocation15_spill] sm:$0xff] %v2284_v42  ;;  %3458 = vst [vmem:[#allocation16_spill] sm:$0xff] %v2286_v43  ;;  %1820 = vpow2.f32 %v275_v40  ;;  %v252_v44 = vsub.f32 %v2151_v21, %v2284_v42  ;;  %v251_v45 = vsub.f32 %v2156_v22, %v2286_v43 }
  0xa2   :  { %1822 = vpow2.f32 %v273_v41  ;;  %v1807_v46 = vpop.eup %1806 }
  0xa3   :  { %v279_v47 = vmul.f32 1.442695, %v252_v44  ;;  %v277_v48 = vmul.f32 1.442695, %v251_v45  ;;  %v1809_v49 = vpop.eup %1808  ;;  %1762 = vmatmul.mubr.msk.f32.vlgmr.msra.gmra.mxu0 %vm192_vm0, %v1807_v46 }
  0xa4   :  { %v2293_v50 = vpop.xlane.xlu1 %233  ;;  %v2295_v51 = vpop.xlane.xlu0 %230  ;;  %1764 = vmatprep.mubr.msk.f32.mxu0 %vm192_vm0, %v1809_v49 }
  0xa5   :  { %3459 = vst [vmem:[#allocation17_spill] sm:$0xff] %v2293_v50  ;;  %3460 = vst [vmem:[#allocation18_spill] sm:$0xff] %v2295_v51  ;;  %1824 = vpow2.f32 %v279_v47  ;;  %v254_v52 = vsub.f32 %v2165_v25, %v2293_v50  ;;  %v253_v53 = vsub.f32 %v2170_v26, %v2295_v51  ;;  %v1811_v54 = vpop.eup %1810 }
  0xa6   :  { %1826 = vpow2.f32 %v277_v48  ;;  %v1813_v55 = vpop.eup %1812 }
  0xa7   :  { %v283_v58 = vmul.f32 1.442695, %v254_v52  ;;  %v281_v59 = vmul.f32 1.442695, %v253_v53  ;;  %1765 = vmatmul.mubr.msk.f32.gmra.mxu0 %vm192_vm0, %v1811_v54  ;;  %v1815_v7 = vpop.eup %1814 }
  0xa8   :  { %v2303_v60 = vpop.xlane.xlu1 %239  ;;  %v2305_v63 = vpop.xlane.xlu0 %236  ;;  %1767 = vmatprep.mubr.msk.f32.mxu0 %vm192_vm0, %v1813_v55 }
  0xa9   :  { %3461 = vst [vmem:[#allocation19_spill] sm:$0xff] %v2303_v60  ;;  %3462 = vst [vmem:[#allocation20_spill] sm:$0xff] %v2305_v63  ;;  %1828 = vpow2.f32 %v283_v58  ;;  %v256_v3 = vsub.f32 %v2179_v30, %v2303_v60  ;;  %v255_v4 = vsub.f32 %v2184_v31, %v2305_v63 }
  0xaa   :  { %1830 = vpow2.f32 %v281_v59  ;;  %v1817_v12 = vpop.eup %1816 }
  0xab   :  { %v287_v15 = vmul.f32 1.442695, %v256_v3  ;;  %v285_v16 = vmul.f32 1.442695, %v255_v4  ;;  %1768 = vmatmul.mubr.msk.f32.gmra.mxu0 %vm192_vm0, %v1815_v7  ;;  %v1819_v24 = vpop.eup %1818 }
  0xac   :  { %v92_v19 = vpop.permute.xlu1 %91  ;;  %1770 = vmatprep.mubr.msk.f32.mxu0 %vm192_vm0, %v1817_v12 }
  0xad   :  { %1832 = vpow2.f32 %v287_v15  ;;  %vm136_vm4 = vcmp.eq.s32.totalorder %v2190_v35, %v92_v19 }
  0xae   :  { %v1821_v27 = vpop.eup %1820  ;;  %1834 = vpow2.f32 %v285_v16  ;;  %v2316_v28 = vsel %vm136_vm4, 1.0, %v2035_v37 }
  0xaf   :  { %3463 = vst [vmem:[#allocation21_spill] sm:$0xff] %v2316_v28  ;;  %v1823_v29 = vpop.eup %1822  ;;  %v503_v32 = vmul.f32 %v2316_v28, %v2098_v5  ;;  %1771 = vmatmul.mubr.msk.f32.gmra.mxu0 %vm192_vm0, %v1819_v24 }
  0xb0   :  { %1773 = vmatprep.mubr.msk.f32.mxu1 %vm192_vm0, %v1823_v29  ;;  %v95_v36 = vpop.permute.xlu1 %94  ;;  %v89_v38 = vpop.permute.xlu0 %88 }
  0xb1   :  { %vm137_vm5 = vcmp.eq.s32.totalorder %v2190_v35, %v95_v36  ;;  %1774 = vmatmul.mubr.msk.f32.vlgmr.msra.gmra.mxu1 %vm192_vm0, %v1821_v27  ;;  %vm135_vm6 = vcmp.eq.s32.totalorder %v2190_v35, %v89_v38  ;;  %v521_v39 = vsel %vm192_vm0, %v503_v32, 0.0 }
  0xb2   :  { %v1825_v40 = vpop.eup %1824  ;;  %v2327_v41 = vsel %vm137_vm5, 1.0, %v2035_v37  ;;  %v2330_v5 = vsel %vm135_vm6, 1.0, %v2035_v37  ;;  %522 = vadd.xlane.f32.xlu0 %v521_v39  ;;  %vm1094_vm5 = vcmask 7168  }
  0xb3   :  { %3464 = vst [vmem:[#allocation22_spill] sm:$0xff] %v2327_v41  ;;  %3465 = vst [vmem:[#allocation23_spill] sm:$0xff] %v2330_v5  ;;  %v1827_v44 = vpop.eup %1826  ;;  %v504_v45 = vmul.f32 %v2327_v41, %v2079_v0  ;;  %v502_v46 = vmul.f32 %v2330_v5, %v2084_v1 }
  0xb4   :  { %1776 = vmatprep.mubr.msk.f32.mxu1 %vm192_vm0, %v1827_v44  ;;  %v98_v47 = vpop.permute.xlu1 %97  ;;  %v116_v55 = vpop.permute.xlu0 %115 }
  0xb5   :  { %vm138_vm7 = vcmp.eq.s32.totalorder %v2190_v35, %v98_v47  ;;  %1777 = vmatmul.mubr.msk.f32.gmra.mxu1 %vm192_vm0, %v1825_v40  ;;  %v524_v48 = vsel %vm192_vm0, %v504_v45, 0.0  ;;  %v518_v49 = vsel %vm192_vm0, %v502_v46, 0.0  ;;  %vm144_vm11 = vcmp.eq.s32.totalorder %v2190_v35, %v116_v55 }
  0xb6   :  { %v1829_v52 = vpop.eup %1828  ;;  %v2342_v53 = vsel %vm138_vm7, 1.0, %v2035_v37  ;;  %525 = vadd.xlane.f32.xlu0 %v524_v48  ;;  %519 = vadd.xlane.f32.xlu1 %v518_v49  ;;  %v2373_v36 = vsel %vm144_vm11, 1.0, %v2035_v37 }
  0xb7   :  { %3466 = vst [vmem:[#allocation24_spill] sm:$0xff] %v2342_v53  ;;  %v1831_v0 = vpop.eup %1830  ;;  %v505_v1 = vmul.f32 %v2342_v53, %v2089_v2  ;;  %3470 = vst [vmem:[#allocation28_spill] sm:$0xff] %v2373_v36 }
  0xb8   :  { %1779 = vmatprep.mubr.msk.f32.mxu1 %vm192_vm0, %v1831_v0  ;;  %v101_v54 = vpop.permute.xlu1 %100  ;;  %v122_v16 = vpop.permute.xlu0 %121 }
  0xb9   :  { %vm139_vm8 = vcmp.eq.s32.totalorder %v2190_v35, %v101_v54  ;;  %1780 = vmatmul.mubr.msk.f32.gmra.mxu1 %vm192_vm0, %v1829_v52  ;;  %v527_v58 = vsel %vm192_vm0, %v505_v1, 0.0  ;;  %vm146_vm13 = vcmp.eq.s32.totalorder %v2190_v35, %v122_v16 }
  0xba   :  { %v1833_v59 = vpop.eup %1832  ;;  %v2351_v3 = vsel %vm139_vm8, 1.0, %v2035_v37  ;;  %528 = vadd.xlane.f32.xlu1 %v527_v58  ;;  %v2386_v45 = vsel %vm146_vm13, 1.0, %v2035_v37 }
  0xbb   :  { %3467 = vst [vmem:[#allocation25_spill] sm:$0xff] %v2351_v3  ;;  %v1835_v4 = vpop.eup %1834  ;;  %v506_v7 = vmul.f32 %v2351_v3, %v2114_v10  ;;  %3472 = vst [vmem:[#allocation30_spill] sm:$0xff] %v2386_v45  ;;  %v513_v49 = vmul.f32 %v2386_v45, %v2151_v21 }
  0xbc   :  { %1782 = vmatprep.mubr.msk.f32.mxu1 %vm192_vm0, %v1835_v4  ;;  %v104_v2 = vpop.permute.xlu1 %103  ;;  %v128_v38 = vpop.permute.xlu0 %127 }
  0xbd   :  { %vm140_vm9 = vcmp.eq.s32.totalorder %v2190_v35, %v104_v2  ;;  %1783 = vmatmul.mubr.msk.f32.gmra.mxu1 %vm192_vm0, %v1833_v59  ;;  %v530_v12 = vsel %vm192_vm0, %v506_v7, 0.0  ;;  %vm148_vm15 = vcmp.eq.s32.totalorder %v2190_v35, %v128_v38  ;;  %v551_v21 = vsel %vm192_vm0, %v513_v49, 0.0  ;;  %v57_v38 = vld [vmem:[%s3394_s2 + $0x20] sm:$0xff]  ;;  %v60_v49 = vld [vmem:[%s3394_s2 + $0x38] sm:$0xff] }
  0xbe   :  { %v2360_v15 = vsel %vm140_vm9, 1.0, %v2035_v37  ;;  %531 = vadd.xlane.f32.xlu0 %v530_v12  ;;  %v2400_v0 = vsel %vm148_vm15, 1.0, %v2035_v37 }
  0xbf   :  { %3468 = vst [vmem:[#allocation26_spill] sm:$0xff] %v2360_v15  ;;  %v507_v19 = vmul.f32 %v2360_v15, %v2109_v9  ;;  %3474 = vst [vmem:[#allocation32_spill] sm:$0xff] %v2400_v0  ;;  %v515_v55 = vmul.f32 %v2400_v0, %v2165_v25 }
  0xc0   :  { %v107_v24 = vpop.permute.xlu1 %106  ;;  %v134_v48 = vpop.permute.xlu0 %133 }
  0xc1   :  { %vm141_vm10 = vcmp.eq.s32.totalorder %v2190_v35, %v107_v24  ;;  %v533_v10 = vsel %vm192_vm0, %v507_v19, 0.0  ;;  %vm150_vm2 = vcmp.eq.s32.totalorder %v2190_v35, %v134_v48  ;;  %v557_v2 = vsel %vm192_vm0, %v515_v55, 0.0 }
  0xc2   :  { %v2368_v27 = vsel %vm141_vm10, 1.0, %v2035_v37  ;;  %534 = vadd.xlane.f32.xlu1 %v533_v10  ;;  %v2414_v59 = vsel %vm150_vm2, 1.0, %v2035_v37 }
  0xc3   :  { %3469 = vst [vmem:[#allocation27_spill] sm:$0xff] %v2368_v27  ;;  %v508_v29 = vmul.f32 %v2368_v27, %v2128_v14  ;;  %v511_v14 = vmul.f32 %v2373_v36, %v2137_v17  ;;  %3476 = vst [vmem:[#allocation34_spill] sm:$0xff] %v2414_v59  ;;  %v517_v25 = vmul.f32 %v2414_v59, %v2179_v30  ;;  %v54_v30 = vld [vmem:[%s3394_s2 + $0x8] sm:$0xff] }
  0xc4   :  { %v110_v32 = vpop.permute.xlu1 %109 }
  0xc5   :  { %vm142_vm12 = vcmp.eq.s32.totalorder %v2190_v35, %v110_v32  ;;  %v536_v9 = vsel %vm192_vm0, %v508_v29, 0.0  ;;  %v545_v17 = vsel %vm192_vm0, %v511_v14, 0.0  ;;  %v53_v29 = vld [vmem:[%s3394_s2] sm:$0xff] }
  0xc6   :  { %v2379_v39 = vsel %vm142_vm12, 1.0, %v2035_v37  ;;  %537 = vadd.xlane.f32.xlu0 %v536_v9  ;;  %v806_v32 = vsub.f32 1.0, %v53_v29  ;;  %v56_v9 = vld [vmem:[%s3394_s2 + $0x18] sm:$0xff] }
  0xc7   :  { %3471 = vst [vmem:[#allocation29_spill] sm:$0xff] %v2379_v39  ;;  %v509_v40 = vmul.f32 %v2379_v39, %v2123_v13  ;;  %v809_v14 = vsub.f32 1.0, %v56_v9 }
  0xc8   :  { %v113_v44 = vpop.permute.xlu1 %112 }
  0xc9   :  { %vm143_vm14 = vcmp.eq.s32.totalorder %v2190_v35, %v113_v44  ;;  %v539_v46 = vsel %vm192_vm0, %v509_v40, 0.0  ;;  %v810_v40 = vsub.f32 1.0, %v57_v38  ;;  %v59_v44 = vld [vmem:[%s3394_s2 + $0x30] sm:$0xff] }
  0xca   :  { %v2392_v47 = vsel %vm143_vm14, 1.0, %v2035_v37  ;;  %540 = vadd.xlane.f32.xlu1 %v539_v46  ;;  %v58_v46 = vld [vmem:[%s3394_s2 + $0x28] sm:$0xff]  ;;  %v812_v48 = vsub.f32 1.0, %v59_v44 }
  0xcb   :  { %3473 = vst [vmem:[#allocation31_spill] sm:$0xff] %v2392_v47  ;;  %v510_v13 = vmul.f32 %v2392_v47, %v2142_v18 }
  0xcc   :  { %v119_v52 = vpop.permute.xlu1 %118 }
  0xcd   :  { %vm145_vm1 = vcmp.eq.s32.totalorder %v2190_v35, %v119_v52  ;;  %v542_v1 = vsel %vm192_vm0, %v510_v13, 0.0  ;;  %v811_v13 = vsub.f32 1.0, %v58_v46 }
  0xce   :  { %v2406_v54 = vsel %vm145_vm1, 1.0, %v2035_v37  ;;  %543 = vadd.xlane.f32.xlu0 %v542_v1  ;;  %546 = vadd.xlane.f32.xlu1 %v545_v17  ;;  %v61_v17 = vld [vmem:[%s3394_s2 + $0x40] sm:$0xff]  ;;  %v813_v1 = vsub.f32 1.0, %v60_v49 }
  0xcf   :  { %3475 = vst [vmem:[#allocation33_spill] sm:$0xff] %v2406_v54  ;;  %v512_v18 = vmul.f32 %v2406_v54, %v2156_v22  ;;  %v814_v52 = vsub.f32 1.0, %v61_v17 }
  0xd0   :  { %v125_v58 = vpop.permute.xlu1 %124 }
  0xd1   :  { %vm147_vm3 = vcmp.eq.s32.totalorder %v2190_v35, %v125_v58  ;;  %v548_v4 = vsel %vm192_vm0, %v512_v18, 0.0  ;;  %v63_v18 = vld [vmem:[%s3394_s2 + $0x50] sm:$0xff] }
  0xd2   :  { %v2419_v7 = vsel %vm147_vm3, 1.0, %v2035_v37  ;;  %549 = vadd.xlane.f32.xlu0 %v548_v4  ;;  %552 = vadd.xlane.f32.xlu1 %v551_v21  ;;  %v62_v21 = vld [vmem:[%s3394_s2 + $0x48] sm:$0xff]  ;;  %v816_v55 = vsub.f32 1.0, %v63_v18  ;;  %v65_v4 = vld [vmem:[%s3394_s2 + $0x60] sm:$0xff] }
  0xd3   :  { %3477 = vst [vmem:[#allocation35_spill] sm:$0xff] %v2419_v7  ;;  %v514_v22 = vmul.f32 %v2419_v7, %v2170_v26  ;;  %v563_v26 = vsel %vm192_vm0, %v517_v25, 0.0  ;;  %v815_v58 = vsub.f32 1.0, %v62_v21 }
  0xd4   :  { %v131_v12 = vpop.permute.xlu1 %130 }
  0xd5   :  { %vm149_vm4 = vcmp.eq.s32.totalorder %v2190_v35, %v131_v12  ;;  %v554_v16 = vsel %vm192_vm0, %v514_v22, 0.0  ;;  %v807_v35 = vsub.f32 1.0, %v54_v30  ;;  %v64_v22 = vld [vmem:[%s3394_s2 + $0x58] sm:$0xff]  ;;  %v67_v12 = vld [vmem:[%s3394_s2 + $0x70] sm:$0xff] }
  0xd6   :  { %v2429_v19 = vsel %vm149_vm4, 1.0, %v2035_v37  ;;  %555 = vadd.xlane.f32.xlu0 %v554_v16  ;;  %558 = vadd.xlane.f32.xlu1 %v557_v2  ;;  %v55_v37 = vld [vmem:[%s3394_s2 + $0x10] sm:$0xff]  ;;  %v818_v2 = vsub.f32 1.0, %v65_v4  ;;  %v817_v25 = vsub.f32 1.0, %v64_v22  ;;  %v66_v16 = vld [vmem:[%s3394_s2 + $0x68] sm:$0xff] }
  0xd7   :  { %3478 = vst [vmem:[#allocation36_spill] sm:$0xff] %v2429_v19  ;;  %v516_v24 = vmul.f32 %v2429_v19, %v2184_v31  ;;  %v808_v31 = vsub.f32 1.0, %v55_v37 }
  0xd9   :  { %v560_v10 = vsel %vm192_vm0, %v516_v24, 0.0  ;;  %v820_v24 = vsub.f32 1.0, %v67_v12 }
  0xda   :  { %561 = vadd.xlane.f32.xlu0 %v560_v10  ;;  %564 = vadd.xlane.f32.xlu1 %v563_v26  ;;  %v819_v26 = vsub.f32 1.0, %v66_v16  ;;  %v68_v10 = vld [vmem:[%s3394_s2 + $0x78] sm:$0xff] }
  0xdb   :  { %v821_v30 = vsub.f32 1.0, %v68_v10 }
  0xeb   :  { %840 = vrot.lane.b32.xlu1 %v807_v35, %s2037_s16  ;;  %v2038_v35 = vmov 10  }
  0xec   :  { %1800 = vset.pattern.permute.xlu0 %v2038_v35  ;;  %1801 = vset.pattern.permute.xlu1 %v2038_v35 }
  0xef   :  { %842 = vrot.lane.b32.xlu1 %v808_v31, %s2037_s16 }
  0xf0   :  { %838 = vrot.lane.b32.xlu0 %v806_v32, %s2037_s16 }
  0xf3   :  { %846 = vrot.lane.b32.xlu1 %v810_v40, %s2037_s16 }
  0xf4   :  { %844 = vrot.lane.b32.xlu0 %v809_v14, %s2037_s16 }
  0xf7   :  { %850 = vrot.lane.b32.xlu1 %v812_v48, %s2037_s16 }
  0xf8   :  { %848 = vrot.lane.b32.xlu0 %v811_v13, %s2037_s16 }
  0xfb   :  { %854 = vrot.lane.b32.xlu1 %v814_v52, %s2037_s16 }
  0xfc   :  { %852 = vrot.lane.b32.xlu0 %v813_v1, %s2037_s16 }
  0xff   :  { %858 = vrot.lane.b32.xlu1 %v816_v55, %s2037_s16 }
 0x100   :  { %856 = vrot.lane.b32.xlu0 %v815_v58, %s2037_s16 }
 0x103   :  { %862 = vrot.lane.b32.xlu1 %v818_v2, %s2037_s16 }
 0x104   :  { %860 = vrot.lane.b32.xlu0 %v817_v25, %s2037_s16 }
 0x107   :  { %866 = vrot.lane.b32.xlu1 %v820_v24, %s2037_s16 }
 0x108   :  { %864 = vrot.lane.b32.xlu0 %v819_v26, %s2037_s16 }
 0x10c   :  { %868 = vrot.lane.b32.xlu0 %v821_v30, %s2037_s16  ;;  %s2039_s16 = smov 118  }
 0x163   :  { %v2499_v37 = vpop.f32.mrf.mxu0 }
 0x164   :  { %3479 = vst [vmem:[#allocation37_spill] sm:$0xff] %v2499_v37  ;;  %v567_v29 = vmul.f32 %v2499_v37, %v2316_v28 }
 0x165   :  { %v2503_v31 = vpop.f32.mrf.mxu0 }
 0x166   :  { %3480 = vst [vmem:[#allocation38_spill] sm:$0xff] %v2503_v31  ;;  %v585_v32 = vsel %vm192_vm0, %v567_v29, 0.0  ;;  %v566_v38 = vmul.f32 %v2330_v5, %v2503_v31 }
 0x167   :  { %586 = vadd.xlane.f32.xlu1 %v585_v32  ;;  %v2509_v40 = vpop.f32.mrf.mxu0 }
 0x168   :  { %v582_v9 = vsel %vm192_vm0, %v566_v38, 0.0  ;;  %v569_v49 = vmul.f32 %v2509_v40, %v2342_v53 }
 0x169   :  { %583 = vadd.xlane.f32.xlu0 %v582_v9  ;;  %v2515_v46 = vpop.f32.mrf.mxu0 }
 0x16a   :  { %v568_v18 = vmul.f32 %v2327_v41, %v2515_v46  ;;  %v591_v58 = vsel %vm192_vm0, %v569_v49, 0.0  ;;  %v662_v49 = vadd.f32 1e-07, %v2503_v31 }
 0x16b   :  { %v2529_v21 = vpop.f32.mrf.mxu0 }
 0x16c   :  { %3483 = vst [vmem:[#allocation41_spill] sm:$0xff] %v2529_v21  ;;  %v588_v22 = vsel %vm192_vm0, %v568_v18, 0.0  ;;  %v571_v24 = vmul.f32 %v2529_v21, %v2360_v15  ;;  %1836 = vlog2.f32 %v662_v49 }
 0x16d   :  { %v2539_v25 = vpop.f32.mrf.mxu0 }
 0x16e   :  { %v570_v10 = vmul.f32 %v2351_v3, %v2539_v25  ;;  %v597_v29 = vsel %vm192_vm0, %v571_v24, 0.0 }
 0x16f   :  { %v2549_v30 = vpop.f32.mrf.mxu0 }
 0x170   :  { %3486 = vst [vmem:[#allocation44_spill] sm:$0xff] %v2549_v30  ;;  %v594_v38 = vsel %vm192_vm0, %v570_v10, 0.0 }
 0x171   :  { %v2511_v14 = vpop.f32.mrf.mxu1 }
 0x172   :  { %3481 = vst [vmem:[#allocation39_spill] sm:$0xff] %v2511_v14  ;;  %v575_v44 = vmul.f32 %v2511_v14, %v2373_v36 }
 0x173   :  { %v2517_v48 = vpop.f32.mrf.mxu1 }
 0x174   :  { %v609_v13 = vsel %vm192_vm0, %v575_v44, 0.0  ;;  %v574_v17 = vmul.f32 %v2392_v47, %v2517_v48  ;;  %v2559_v44 = vpop.f32.mrf.mxu0 }
 0x175   :  { %v2524_v52 = vpop.f32.mrf.mxu1  ;;  %610 = vadd.xlane.f32.xlu1 %v609_v13 }
 0x176   :  { %3482 = vst [vmem:[#allocation40_spill] sm:$0xff] %v2524_v52  ;;  %v606_v1 = vsel %vm192_vm0, %v574_v17, 0.0  ;;  %v577_v4 = vmul.f32 %v2524_v52, %v2386_v45  ;;  %v573_v17 = vmul.f32 %v2549_v30, %v2379_v39 }
 0x177   :  { %v2531_v55 = vpop.f32.mrf.mxu1  ;;  %607 = vadd.xlane.f32.xlu0 %v606_v1 }
 0x178   :  { %3484 = vst [vmem:[#allocation42_spill] sm:$0xff] %v2531_v55  ;;  %v576_v2 = vmul.f32 %v2406_v54, %v2531_v55  ;;  %v615_v16 = vsel %vm192_vm0, %v577_v4, 0.0  ;;  %v603_v4 = vsel %vm192_vm0, %v573_v17, 0.0  ;;  %v672_v10 = vadd.f32 1e-07, %v2531_v55  ;;  %v2581_v17 = vpop.xlane.xlu1 %519 }
 0x179   :  { %592 = vadd.xlane.f32.xlu1 %v591_v58  ;;  %v2541_v12 = vpop.f32.mrf.mxu1  ;;  %v572_v58 = vmul.f32 %v2368_v27, %v2559_v44  ;;  %3489 = vst [vmem:[#allocation47_spill] sm:$0xff] %v2581_v17 }
 0x17a   :  { %3485 = vst [vmem:[#allocation43_spill] sm:$0xff] %v2541_v12  ;;  %v612_v26 = vsel %vm192_vm0, %v576_v2, 0.0  ;;  %v579_v32 = vmul.f32 %v2541_v12, %v2400_v0  ;;  %v670_v2 = vadd.f32 1e-07, %v2517_v48  ;;  %v675_v53 = vadd.f32 1e-07, %v2541_v12 }
 0x17b   :  { %589 = vadd.xlane.f32.xlu0 %v588_v22  ;;  %v2551_v35 = vpop.f32.mrf.mxu1 }
 0x17c   :  { %3487 = vst [vmem:[#allocation45_spill] sm:$0xff] %v2551_v35  ;;  %v578_v9 = vmul.f32 %v2419_v7, %v2551_v35  ;;  %v621_v13 = vsel %vm192_vm0, %v579_v32, 0.0  ;;  %1838 = vlog2.f32 %v670_v2  ;;  %v1837_v32 = vpop.eup %1836  ;;  %v2586_v2 = vpop.xlane.xlu0 %522 }
 0x17d   :  { %616 = vadd.xlane.f32.xlu1 %v615_v16  ;;  %v2565_v1 = vpop.f32.mrf.mxu1  ;;  %v600_v16 = vsel %vm192_vm0, %v572_v58, 0.0  ;;  %1840 = vrcp.f32 %v2499_v37  ;;  %3490 = vst [vmem:[#allocation48_spill] sm:$0xff] %v2586_v2 }
 0x17e   :  { %3488 = vst [vmem:[#allocation46_spill] sm:$0xff] %v2565_v1  ;;  %v618_v18 = vsel %vm192_vm0, %v578_v9, 0.0  ;;  %v581_v22 = vmul.f32 %v2565_v1, %v2414_v59  ;;  %v674_v9 = vadd.f32 1e-07, %v2551_v35  ;;  %v677_v50 = vadd.f32 1e-07, %v2565_v1 }
 0x17f   :  { %613 = vadd.xlane.f32.xlu0 %v612_v26  ;;  %v664_v26 = vadd.f32 1e-07, %v2515_v46 }
 0x180   :  { %v627_v24 = vsel %vm192_vm0, %v581_v22, 0.0 }
 0x181   :  { %598 = vadd.xlane.f32.xlu1 %v597_v29  ;;  %1842 = vlog2.f32 %v664_v26  ;;  %v666_v29 = vadd.f32 1e-07, %v2539_v25  ;;  %v2592_v26 = vpop.xlane.xlu1 %528 }
 0x182   :  { %1844 = vlog2.f32 %v672_v10  ;;  %3492 = vst [vmem:[#allocation50_spill] sm:$0xff] %v2592_v26 }
 0x183   :  { %595 = vadd.xlane.f32.xlu0 %v594_v38  ;;  %v679_v38 = vmul.f32 0.6931472, %v1837_v32  ;;  %1846 = vlog2.f32 %v666_v29 }
 0x184   :  { %1848 = vlog2.f32 %v674_v9  ;;  %v2596_v9 = vpop.xlane.xlu0 %525 }
 0x185   :  { %622 = vadd.xlane.f32.xlu1 %v621_v13  ;;  %v710_v58 = vsub.f32 0.0, %v679_v38  ;;  %3493 = vst [vmem:[#allocation51_spill] sm:$0xff] %v2596_v9 }
 0x187   :  { %619 = vadd.xlane.f32.xlu0 %v618_v18  ;;  %v668_v18 = vadd.f32 1e-07, %v2559_v44 }
 0x189   :  { %604 = vadd.xlane.f32.xlu1 %v603_v4  ;;  %v1839_v13 = vpop.eup %1838  ;;  %1850 = vlog2.f32 %v668_v18 }
 0x18a   :  { %v2583_v49 = vpop.eup %1840  ;;  %v695_v4 = vmul.f32 0.6931472, %v1839_v13  ;;  %v2598_v13 = vpop.xlane.xlu1 %534 }
 0x18b   :  { %601 = vadd.xlane.f32.xlu0 %v600_v16  ;;  %v2588_v16 = vpop.f32.mrf.mxu1  ;;  %v1136_v10 = vmul.f32 2.0, %v2583_v49  ;;  %3494 = vst [vmem:[#allocation52_spill] sm:$0xff] %v2598_v13 }
 0x18c   :  { %3491 = vst [vmem:[#allocation49_spill] sm:$0xff] %v2588_v16  ;;  %v718_v29 = vsub.f32 0.0, %v695_v4 }
 0x18d   :  { %628 = vadd.xlane.f32.xlu1 %v627_v24  ;;  %v676_v24 = vadd.f32 1e-07, %v2588_v16 }
 0x18e   :  { %v1843_v22 = vpop.eup %1842  ;;  %v2603_v59 = vpop.xlane.xlu1 %540 }
 0x18f   :  { %v683_v32 = vmul.f32 0.6931472, %v1843_v22  ;;  %v1845_v38 = vpop.eup %1844  ;;  %1852 = vlog2.f32 %v676_v24  ;;  %3496 = vst [vmem:[#allocation54_spill] sm:$0xff] %v2603_v59 }
 0x190   :  { %v699_v7 = vmul.f32 0.6931472, %v1845_v38  ;;  %v1847_v54 = vpop.eup %1846  ;;  %1854 = vrcp.f32 %v2503_v31 }
 0x191   :  { %v712_v6 = vsub.f32 0.0, %v683_v32  ;;  %v687_v4 = vmul.f32 0.6931472, %v1847_v54  ;;  %v1849_v22 = vpop.eup %1848 }
 0x192   :  { %v720_v18 = vsub.f32 0.0, %v699_v7  ;;  %v2608_v0 = vpop.xlane.xlu1 %546 }
 0x193   :  { %3498 = vst [vmem:[#allocation56_spill] sm:$0xff] %v2608_v0 }
 0x196   :  { %v1851_v47 = vpop.eup %1850  ;;  %v2614_v7 = vpop.xlane.xlu1 %552 }
 0x197   :  { %v691_v27 = vmul.f32 0.6931472, %v1851_v47  ;;  %3500 = vst [vmem:[#allocation58_spill] sm:$0xff] %v2614_v7  ;;  %v580_v47 = vmul.f32 %v2429_v19, %v2588_v16  ;;  %v665_v19 = vadd.f32 1e-07, %v2509_v40 }
 0x19c   :  { %v1853_v32 = vpop.eup %1852 }
 0x19d   :  { %v707_v54 = vmul.f32 0.6931472, %v1853_v32  ;;  %v624_v32 = vsel %vm192_vm0, %v580_v47, 0.0  ;;  %v2646_v41 = vpop.eup %1854 }
 0x19e   :  { %918 = vrot.lane.b32.xlu1 %v710_v58, %s2039_s16  ;;  %v2601_v58 = vpop.xlane.xlu0 %531 }
 0x19f   :  { %3495 = vst [vmem:[#allocation53_spill] sm:$0xff] %v2601_v58 }
 0x1a1   :  { %1158 = vperm.xlu0 %1800, %v1136_v10   ;;  %v714_v10 = vsub.f32 0.0, %v687_v4  ;;  %v724_v4 = vsub.f32 0.0, %v707_v54 }
 0x1a2   :  { %934 = vrot.lane.b32.xlu1 %v718_v29, %s2039_s16  ;;  %v2606_v24 = vpop.xlane.xlu0 %537  ;;  %v703_v29 = vmul.f32 0.6931472, %v1849_v22  ;;  %v2619_v22 = vpop.xlane.xlu1 %558 }
 0x1a3   :  { %3497 = vst [vmem:[#allocation55_spill] sm:$0xff] %v2606_v24  ;;  %3502 = vst [vmem:[#allocation60_spill] sm:$0xff] %v2619_v22 }
 0x1a4   :  { %v722_v38 = vsub.f32 0.0, %v703_v29 }
 0x1a6   :  { %922 = vrot.lane.b32.xlu1 %v712_v6, %s2039_s16  ;;  %v2611_v6 = vpop.xlane.xlu0 %543  ;;  %v2626_v29 = vpop.xlane.xlu1 %564 }
 0x1a7   :  { %3499 = vst [vmem:[#allocation57_spill] sm:$0xff] %v2611_v6  ;;  %3504 = vst [vmem:[#allocation62_spill] sm:$0xff] %v2626_v29 }
 0x1aa   :  { %938 = vrot.lane.b32.xlu1 %v720_v18, %s2039_s16  ;;  %v716_v18 = vsub.f32 0.0, %v691_v27  ;;  %v2616_v45 = vpop.xlane.xlu0 %549  ;;  %v663_v27 = vadd.f32 1e-07, %v2499_v37  ;;  %v2633_v54 = vpop.permute.xlu1 %840 }
 0x1ab   :  { %3501 = vst [vmem:[#allocation59_spill] sm:$0xff] %v2616_v45 }
 0x1ac   :  { %1856 = vlog2.f32 %v663_v27  ;;  %v667_v27 = vadd.f32 1e-07, %v2529_v21 }
 0x1ae   :  { %926 = vrot.lane.b32.xlu1 %v714_v10, %s2039_s16  ;;  %v2622_v10 = vpop.xlane.xlu0 %555  ;;  %v2639_v3 = vpop.permute.xlu1 %842 }
 0x1af   :  { %3503 = vst [vmem:[#allocation61_spill] sm:$0xff] %v2622_v10 }
 0x1b2   :  { %942 = vrot.lane.b32.xlu1 %v722_v38, %s2039_s16  ;;  %v2630_v38 = vpop.xlane.xlu0 %561  ;;  %v2644_v36 = vpop.permute.xlu1 %846 }
 0x1b3   :  { %3505 = vst [vmem:[#allocation63_spill] sm:$0xff] %v2630_v38 }
 0x1b6   :  { %930 = vrot.lane.b32.xlu1 %v716_v18, %s2039_s16  ;;  %v671_v18 = vadd.f32 1e-07, %v2511_v14 }
 0x1b8   :  { %1858 = vlog2.f32 %v671_v18  ;;  %v1135_v18 = vmul.f32 2.0, %v2646_v41 }
 0x1b9   :  { %1860 = vlog2.f32 %v665_v19  ;;  %v1857_v39 = vpop.eup %1856  ;;  %v2653_v19 = vpop.permute.xlu1 %850 }
 0x1ba   :  { %946 = vrot.lane.b32.xlu1 %v724_v4, %s2039_s16  ;;  %v2636_v4 = vpop.permute.xlu0 %838  ;;  %v681_v15 = vmul.f32 0.6931472, %v1857_v39 }
 0x1bc   :  { %v711_v63 = vsub.f32 0.0, %v681_v15 }
 0x1bd   :  { %v2659_v22 = vpop.permute.xlu1 %854 }
 0x1be   :  { %v2641_v47 = vpop.permute.xlu0 %844 }
 0x1c0   :  { %625 = vadd.xlane.f32.xlu0 %v624_v32  ;;  %v673_v32 = vadd.f32 1e-07, %v2524_v52 }
 0x1c2   :  { %1862 = vlog2.f32 %v673_v32  ;;  %v2649_v5 = vpop.permute.xlu0 %848  ;;  %v669_v32 = vadd.f32 1e-07, %v2549_v30 }
 0x1c3   :  { %1864 = vlog2.f32 %v667_v27 }
 0x1c4   :  { %1866 = vlog2.f32 %v675_v53 }
 0x1c5   :  { %v1859_v28 = vpop.eup %1858  ;;  %1868 = vlog2.f32 %v669_v32 }
 0x1c6   :  { %v2655_v38 = vpop.permute.xlu0 %852  ;;  %v697_v29 = vmul.f32 0.6931472, %v1859_v28  ;;  %v1861_v60 = vpop.eup %1860  ;;  %1870 = vlog2.f32 %v677_v50 }
 0x1c7   :  { %v685_v27 = vmul.f32 0.6931472, %v1861_v60 }
 0x1c8   :  { %v719_v39 = vsub.f32 0.0, %v697_v29 }
 0x1c9   :  { %v713_v15 = vsub.f32 0.0, %v685_v27 }
 0x1ca   :  { %v2662_v51 = vpop.permute.xlu0 %856 }
 0x1cf   :  { %v1863_v10 = vpop.eup %1862 }
 0x1d0   :  { %v701_v28 = vmul.f32 0.6931472, %v1863_v10  ;;  %v1865_v53 = vpop.eup %1864 }
 0x1d1   :  { %v689_v60 = vmul.f32 0.6931472, %v1865_v53  ;;  %v1867_v32 = vpop.eup %1866 }
 0x1d2   :  { %v721_v29 = vsub.f32 0.0, %v701_v28  ;;  %v705_v45 = vmul.f32 0.6931472, %v1867_v32 }
 0x1d3   :  { %v715_v42 = vsub.f32 0.0, %v689_v60 }
 0x1d4   :  { %v723_v50 = vsub.f32 0.0, %v705_v45 }
 0x1d6   :  { %1153 = vperm.xlu0 %1800, %v1135_v18   ;;  %v2665_v18 = vpop.permute.xlu1 %858 }
 0x1da   :  { %920 = vrot.lane.b32.xlu0 %v711_v63, %s2039_s16  ;;  %v2668_v63 = vpop.permute.xlu0 %860  ;;  %v2671_v7 = vpop.permute.xlu1 %862 }
 0x1de   :  { %936 = vrot.lane.b32.xlu0 %v719_v39, %s2039_s16  ;;  %v1869_v39 = vpop.eup %1868  ;;  %v2673_v27 = vpop.permute.xlu0 %864 }
 0x1df   :  { %v693_v10 = vmul.f32 0.6931472, %v1869_v39  ;;  %v1871_v43 = vpop.eup %1870 }
 0x1e1   :  { %v717_v53 = vsub.f32 0.0, %v693_v10 }
 0x1e2   :  { %924 = vrot.lane.b32.xlu0 %v713_v15, %s2039_s16  ;;  %v2676_v15 = vpop.permute.xlu1 %866  ;;  %v2679_v28 = vpop.permute.xlu0 %868 }
 0x1e6   :  { %940 = vrot.lane.b32.xlu0 %v721_v29, %s2039_s16  ;;  %v709_v29 = vmul.f32 0.6931472, %v1871_v43 }
 0x1e8   :  { %v725_v39 = vsub.f32 0.0, %v709_v29 }
 0x1ea   :  { %928 = vrot.lane.b32.xlu0 %v715_v42, %s2039_s16 }
 0x1ee   :  { %944 = vrot.lane.b32.xlu0 %v723_v50, %s2039_s16 }
 0x1f0   :  { %v2681_v24 = vpop.xlane.xlu1 %586 }
 0x1f1   :  { %v727_v60 = vsub.f32 %v2499_v37, %v2681_v24 }
 0x1f2   :  { %932 = vrot.lane.b32.xlu0 %v717_v53, %s2039_s16  ;;  %v2686_v32 = vpop.xlane.xlu0 %583 }
 0x1f3   :  { %v743_v42 = vmax.f32 %v727_v60, 0.0  ;;  %v726_v45 = vsub.f32 %v2503_v31, %v2686_v32 }
 0x1f5   :  { %v742_v23 = vmax.f32 %v726_v45, 0.0  ;;  %v759_v50 = vadd.f32 1e-07, %v743_v42 }
 0x1f6   :  { %948 = vrot.lane.b32.xlu0 %v725_v39, %s2039_s16 }
 0x1f7   :  { %v758_v10 = vadd.f32 1e-07, %v742_v23  ;;  %1872 = vlog2.f32 %v759_v50 }
 0x1f9   :  { %1874 = vlog2.f32 %v758_v10 }
 0x1fa   :  { %1876 = vrcp.f32 %v2541_v12 }
 0x1fe   :  { %v2691_v43 = vpop.xlane.xlu1 %610 }
 0x1ff   :  { %v735_v53 = vsub.f32 %v2511_v14, %v2691_v43 }
 0x200   :  { %v2693_v0 = vpop.xlane.xlu0 %607 }
 0x201   :  { %v734_v60 = vsub.f32 %v2517_v48, %v2693_v0  ;;  %v751_v45 = vmax.f32 %v735_v53, 0.0 }
 0x202   :  { %v2699_v37 = vpop.xlane.xlu1 %592 }
 0x203   :  { %v750_v29 = vmax.f32 %v734_v60, 0.0  ;;  %v729_v23 = vsub.f32 %v2509_v40, %v2699_v37  ;;  %v767_v20 = vadd.f32 1e-07, %v751_v45 }
 0x204   :  { %v2704_v42 = vpop.xlane.xlu0 %589  ;;  %v1873_v6 = vpop.eup %1872 }
 0x205   :  { %v766_v39 = vadd.f32 1e-07, %v750_v29  ;;  %v728_v50 = vsub.f32 %v2515_v46, %v2704_v42  ;;  %v745_v31 = vmax.f32 %v729_v23, 0.0  ;;  %v777_v11 = vmul.f32 0.6931472, %v1873_v6 }
 0x206   :  { %v2708_v10 = vpop.xlane.xlu1 %616  ;;  %v1875_v59 = vpop.eup %1874 }
 0x207   :  { %v737_v33 = vsub.f32 %v2524_v52, %v2708_v10  ;;  %v744_v60 = vmax.f32 %v728_v50, 0.0  ;;  %1878 = vlog2.f32 %v766_v39  ;;  %v761_v53 = vadd.f32 1e-07, %v745_v31  ;;  %v2730_v56 = vpop.eup %1876 }
 0x208   :  { %v2712_v34 = vpop.xlane.xlu0 %613  ;;  %1880 = vrcp.f32 %v2565_v1  ;;  %v775_v23 = vmul.f32 0.6931472, %v1875_v59  ;;  %v887_v39 = vmul.f32 %v2633_v54, %v777_v11 }
 0x209   :  { %v760_v13 = vadd.f32 1e-07, %v744_v60  ;;  %v753_v29 = vmax.f32 %v737_v33, 0.0  ;;  %v736_v58 = vsub.f32 %v2531_v55, %v2712_v34  ;;  %1882 = vlog2.f32 %v767_v20 }
 0x20a   :  { %v2714_v8 = vpop.xlane.xlu1 %598  ;;  %1000 = vrot.lane.b32.xlu0 %v887_v39, %s2039_s16  ;;  %v886_v59 = vmul.f32 %v2636_v4, %v775_v23 }
 0x20b   :  { %v731_v50 = vsub.f32 %v2529_v21, %v2714_v8  ;;  %v752_v45 = vmax.f32 %v736_v58, 0.0  ;;  %1884 = vlog2.f32 %v760_v13  ;;  %v769_v33 = vadd.f32 1e-07, %v753_v29 }
 0x20c   :  { %v2721_v26 = vpop.xlane.xlu0 %595  ;;  %1886 = vlog2.f32 %v761_v53  ;;  %998 = vrot.lane.b32.xlu1 %v886_v59, %s2039_s16 }
 0x20d   :  { %v768_v31 = vadd.f32 1e-07, %v752_v45  ;;  %v747_v61 = vmax.f32 %v731_v50, 0.0  ;;  %v730_v6 = vsub.f32 %v2539_v25, %v2721_v26 }
 0x20e   :  { %v623_v60 = vpop.xlane.xlu1 %622 }
 0x20f   :  { %1888 = vlog2.f32 %v768_v31  ;;  %v746_v11 = vmax.f32 %v730_v6, 0.0  ;;  %v739_v20 = vsub.f32 %v2541_v12, %v623_v60  ;;  %v2735_v13 = vmul.f32 %v2730_v56, %v623_v60 }
 0x210   :  { %v2728_v9 = vpop.xlane.xlu0 %619  ;;  %1890 = vlog2.f32 %v769_v33  ;;  %v763_v54 = vadd.f32 1e-07, %v747_v61 }
 0x211   :  { %3506 = vst [vmem:[#allocation64_spill] sm:$0xff] %v2735_v13  ;;  %v738_v4 = vsub.f32 %v2551_v35, %v2728_v9  ;;  %v762_v53 = vadd.f32 1e-07, %v746_v11  ;;  %v755_v29 = vmax.f32 %v739_v20, 0.0 }
 0x212   :  { %v2737_v58 = vpop.xlane.xlu1 %604 }
 0x213   :  { %v754_v23 = vmax.f32 %v738_v4, 0.0  ;;  %v733_v50 = vsub.f32 %v2549_v30, %v2737_v58  ;;  %1892 = vlog2.f32 %v762_v53  ;;  %v771_v45 = vadd.f32 1e-07, %v755_v29 }
 0x214   :  { %v2743_v39 = vpop.xlane.xlu0 %601  ;;  %v1879_v31 = vpop.eup %1878  ;;  %1894 = vlog2.f32 %v763_v54 }
 0x215   :  { %v770_v60 = vadd.f32 1e-07, %v754_v23  ;;  %v749_v59 = vmax.f32 %v733_v50, 0.0  ;;  %v2745_v6 = vpop.eup %1880  ;;  %v732_v61 = vsub.f32 %v2559_v44, %v2743_v39  ;;  %v791_v11 = vmul.f32 0.6931472, %v1879_v31 }
 0x216   :  { %v1883_v33 = vpop.eup %1882  ;;  %1896 = vlog2.f32 %v771_v45  ;;  %v629_v20 = vpop.xlane.xlu1 %628 }
 0x217   :  { %1898 = vlog2.f32 %v770_v60  ;;  %v765_v12 = vadd.f32 1e-07, %v749_v59  ;;  %v748_v29 = vmax.f32 %v732_v61, 0.0  ;;  %v2750_v2 = vmul.f32 %v2745_v6, %v629_v20 }
 0x218   :  { %v1885_v4 = vpop.eup %1884  ;;  %v793_v62 = vmul.f32 0.6931472, %v1883_v33  ;;  %v894_v17 = vmul.f32 %v2659_v22, %v791_v11 }
 0x219   :  { %v1887_v53 = vpop.eup %1886  ;;  %v779_v23 = vmul.f32 0.6931472, %v1885_v4  ;;  %v764_v50 = vadd.f32 1e-07, %v748_v29  ;;  %1900 = vlog2.f32 %v765_v12 }
 0x21a   :  { %v781_v57 = vmul.f32 0.6931472, %v1887_v53  ;;  %1014 = vrot.lane.b32.xlu1 %v894_v17, %s2039_s16  ;;  %1902 = vrcp.f32 %v2517_v48  ;;  %v895_v45 = vmul.f32 %v2662_v51, %v793_v62  ;;  %v741_v17 = vsub.f32 %v2565_v1, %v629_v20 }
 0x21b   :  { %1904 = vlog2.f32 %v764_v50  ;;  %v888_v60 = vmul.f32 %v2639_v3, %v779_v23 }
 0x21c   :  { %v1889_v54 = vpop.eup %1888  ;;  %1016 = vrot.lane.b32.xlu0 %v895_v45, %s2039_s16  ;;  %v889_v33 = vmul.f32 %v2641_v47, %v781_v57  ;;  %1906 = vrcp.f32 %v2515_v46  ;;  %v757_v47 = vmax.f32 %v741_v17, 0.0  ;;  %v2792_v17 = vld [vmem:[%s3395_s3 + $0x8] sm:$0xff] }
 0x21d   :  { %v1891_v13 = vpop.eup %1890  ;;  %v795_v31 = vmul.f32 0.6931472, %v1889_v54  ;;  %1908 = vrcp.f32 %v2509_v40 }
 0x21e   :  { %v797_v61 = vmul.f32 0.6931472, %v1891_v13  ;;  %1002 = vrot.lane.b32.xlu1 %v888_v60, %s2039_s16  ;;  %1910 = vrcp.f32 %v2539_v25 }
 0x21f   :  { %v896_v12 = vmul.f32 %v2665_v18, %v795_v31 }
 0x220   :  { %v1893_v59 = vpop.eup %1892  ;;  %1004 = vrot.lane.b32.xlu0 %v889_v33, %s2039_s16  ;;  %v897_v62 = vmul.f32 %v2668_v63, %v797_v61  ;;  %v773_v63 = vadd.f32 1e-07, %v757_v47  ;;  %v1148_v61 = vmul.f32 2.0, %v2730_v56  ;;  %v3507_v56 = vmov 0  }
 0x221   :  { %v1895_v22 = vpop.eup %1894  ;;  %v783_v11 = vmul.f32 0.6931472, %v1893_v59  ;;  %v1407_v47 = vmul.f32 %v2646_v41, %v2686_v32 }
 0x222   :  { %v785_v53 = vmul.f32 0.6931472, %v1895_v22  ;;  %1018 = vrot.lane.b32.xlu1 %v896_v12, %s2039_s16  ;;  %1912 = vlog2.f32 %v773_v63 }
 0x223   :  { %v1897_v4 = vpop.eup %1896  ;;  %v890_v3 = vmul.f32 %v2644_v36, %v783_v11  ;;  %1914 = vrcp.f32 %v2529_v21  ;;  %v1150_v11 = vmul.f32 2.0, %v2745_v6 }
 0x224   :  { %v1899_v51 = vpop.eup %1898  ;;  %v801_v13 = vmul.f32 0.6931472, %v1897_v4  ;;  %1020 = vrot.lane.b32.xlu0 %v897_v62, %s2039_s16  ;;  %v891_v18 = vmul.f32 %v2649_v5, %v785_v53  ;;  %1916 = vrcp.f32 %v2559_v44  ;;  %v2796_v4 = vpop.permute.xlu0 %1158 }
 0x225   :  { %v799_v57 = vmul.f32 0.6931472, %v1899_v51  ;;  %1918 = vrcp.f32 %v2549_v30  ;;  %v3530_v30 = vld [vmem:[#allocation55_spill] sm:$0xff] }
 0x226   :  { %v1901_v20 = vpop.eup %1900  ;;  %1006 = vrot.lane.b32.xlu1 %v890_v3, %s2039_s16  ;;  %v899_v50 = vmul.f32 %v2673_v27, %v801_v13  ;;  %1920 = vrcp.f32 %v2511_v14  ;;  %v3529_v14 = vld [vmem:[#allocation12_spill] sm:$0xff] }
 0x227   :  { %v898_v29 = vmul.f32 %v2671_v7, %v799_v57  ;;  %v2772_v54 = vpop.eup %1902  ;;  %v789_v23 = vmul.f32 0.6931472, %v1901_v20  ;;  %1922 = vrcp.f32 %v2531_v55  ;;  %v636_v55 = vsub.f32 %v3530_v30, %v3529_v14 }
 0x228   :  { %v1905_v36 = vpop.eup %1904  ;;  %1008 = vrot.lane.b32.xlu0 %v891_v18, %s2039_s16  ;;  %v1143_v31 = vmul.f32 2.0, %v2772_v54  ;;  %1924 = vrcp.f32 %v2524_v52 }
 0x229   :  { %v787_v5 = vmul.f32 0.6931472, %v1905_v36  ;;  %v893_v7 = vmul.f32 %v2655_v38, %v789_v23  ;;  %v1907_v45 = vpop.eup %1906 }
 0x22a   :  { %1022 = vrot.lane.b32.xlu1 %v898_v29, %s2039_s16  ;;  %v1137_v27 = vmul.f32 2.0, %v1907_v45  ;;  %v1909_v59 = vpop.eup %1908  ;;  %v1423_v29 = vsub.f32 0.0, %v1407_v47  ;;  %v1409_v63 = vmul.f32 %v1907_v45, %v2704_v42 }
 0x22b   :  { %v892_v60 = vmul.f32 %v2653_v19, %v787_v5  ;;  %v1911_v33 = vpop.eup %1910  ;;  %v1138_v38 = vmul.f32 2.0, %v1909_v59 }
 0x22c   :  { %1024 = vrot.lane.b32.xlu0 %v899_v50, %s2039_s16  ;;  %v1139_v12 = vmul.f32 2.0, %v1911_v33  ;;  %v1439_v50 = vmul.f32 2.0, %v1423_v29  ;;  %v1425_v5 = vsub.f32 0.0, %v1409_v63  ;;  %v1411_v41 = vmul.f32 %v1911_v33, %v2721_v26 }
 0x22d   :  { %v1410_v33 = vmul.f32 %v1909_v59, %v2699_v37 }
 0x22e   :  { %1193 = vperm.xlu1 %1801, %v1143_v31   ;;  %v1455_v42 = vmul.f32 1.442695, %v1439_v50  ;;  %v1441_v45 = vmul.f32 2.0, %v1425_v5 }
 0x22f   :  { %v1913_v22 = vpop.eup %1912  ;;  %v1426_v47 = vsub.f32 0.0, %v1410_v33 }
 0x230   :  { %1012 = vrot.lane.b32.xlu0 %v893_v7, %s2039_s16  ;;  %v805_v19 = vmul.f32 0.6931472, %v1913_v22  ;;  %v1915_v53 = vpop.eup %1914  ;;  %v1408_v7 = vmul.f32 %v2583_v49, %v2681_v24  ;;  %v1459_v49 = vmul.f32 1.442695, %v1441_v45 }
 0x231   :  { %v1140_v62 = vmul.f32 2.0, %v1915_v53  ;;  %v1917_v3 = vpop.eup %1916  ;;  %v1442_v5 = vmul.f32 2.0, %v1426_v47 }
 0x232   :  { %1010 = vrot.lane.b32.xlu1 %v892_v60, %s2039_s16  ;;  %v901_v6 = vmul.f32 %v2679_v28, %v805_v19  ;;  %v1141_v28 = vmul.f32 2.0, %v1917_v3  ;;  %v1919_v18 = vpop.eup %1918  ;;  %v2815_v60 = vpop.permute.xlu1 %918  ;;  %v1424_v26 = vsub.f32 0.0, %v1408_v7  ;;  %v1415_v19 = vmul.f32 %v2772_v54, %v2693_v0 }
 0x233   :  { %v1142_v36 = vmul.f32 2.0, %v1919_v18  ;;  %v1921_v23 = vpop.eup %1920  ;;  %v1461_v45 = vmul.f32 1.442695, %v1442_v5 }
 0x234   :  { %1163 = vperm.xlu0 %1800, %v1137_v27   ;;  %v1144_v32 = vmul.f32 2.0, %v1921_v23  ;;  %v1923_v31 = vpop.eup %1922  ;;  %v1427_v27 = vsub.f32 0.0, %v1411_v41  ;;  %v1431_v37 = vsub.f32 0.0, %v1415_v19 }
 0x235   :  { %v1145_v22 = vmul.f32 2.0, %v1923_v31  ;;  %v1417_v0 = vmul.f32 %v1923_v31, %v2712_v34  ;;  %v2837_v34 = vld [vmem:[%s3395_s3 + $0x10] sm:$0xff] }
 0x236   :  { %1218 = vperm.xlu1 %1801, %v1148_v61   ;;  %v1413_v61 = vmul.f32 %v1917_v3, %v2743_v39  ;;  %v1443_v24 = vmul.f32 2.0, %v1427_v27  ;;  %v1440_v3 = vmul.f32 2.0, %v1424_v26 }
 0x237   :  { %v1433_v31 = vsub.f32 0.0, %v1417_v0 }
 0x238   :  { %1168 = vperm.xlu0 %1800, %v1138_v38   ;;  %v1463_v54 = vmul.f32 1.442695, %v1443_v24  ;;  %v1457_v50 = vmul.f32 1.442695, %v1440_v3 }
 0x239   :  { %v1449_v26 = vmul.f32 2.0, %v1433_v31 }
 0x23a   :  { %1228 = vperm.xlu1 %1801, %v1150_v11   ;;  %v1925_v11 = vpop.eup %1924 }
 0x23c   :  { %1173 = vperm.xlu0 %1800, %v1139_v12   ;;  %v1429_v12 = vsub.f32 0.0, %v1413_v61 }
 0x23e   :  { %1803 = vset.pattern.permute.xlu1 %v3507_v56  ;;  %v1445_v59 = vmul.f32 2.0, %v1429_v12 }
 0x23f   :  { %1286 = vperm.xlu1 %1803, %v2792_v17  }
 0x240   :  { %1028 = vrot.lane.b32.xlu0 %v901_v6, %s2039_s16  ;;  %v2823_v6 = vpop.permute.xlu1 %934  ;;  %v1467_v7 = vmul.f32 1.442695, %v1445_v59 }
 0x244   :  { %1178 = vperm.xlu0 %1800, %v1140_v62  }
 0x248   :  { %1183 = vperm.xlu0 %1800, %v1141_v28  }
 0x249   :  { %v2802_v51 = vpop.xlane.xlu0 %625 }
 0x24a   :  { %v740_v57 = vsub.f32 %v2588_v16, %v2802_v51 }
 0x24c   :  { %v756_v13 = vmax.f32 %v740_v57, 0.0  ;;  %1188 = vperm.xlu0 %1800, %v1142_v36   ;;  %v1146_v57 = vmul.f32 2.0, %v1925_v11 }
 0x24e   :  { %v772_v20 = vadd.f32 1e-07, %v756_v13  ;;  %v1412_v13 = vmul.f32 %v1915_v53, %v2714_v8  ;;  %v2831_v8 = vpop.permute.xlu1 %922  ;;  %v1447_v53 = vmul.f32 2.0, %v1431_v37 }
 0x250   :  { %1926 = vlog2.f32 %v772_v20  ;;  %1198 = vperm.xlu0 %1800, %v1144_v32   ;;  %v1428_v41 = vsub.f32 0.0, %v1412_v13  ;;  %v1414_v32 = vmul.f32 %v1919_v18, %v2737_v58  ;;  %v1416_v58 = vmul.f32 %v1921_v23, %v2691_v43  ;;  %v2850_v43 = vld [vmem:[%s3395_s3] sm:$0xff]  ;;  %v2861_v13 = vld [vmem:[%s3395_s3 + $0x18] sm:$0xff] }
 0x251   :  { %1928 = vrcp.f32 %v2551_v35  ;;  %v2818_v38 = vpop.permute.xlu0 %1153  ;;  %v1418_v23 = vmul.f32 %v1925_v11, %v2708_v10  ;;  %v3527_v35 = vld [vmem:[#allocation56_spill] sm:$0xff] }
 0x252   :  { %1930 = vrcp.f32 %v2588_v16  ;;  %v1444_v27 = vmul.f32 2.0, %v1428_v41  ;;  %v1430_v61 = vsub.f32 0.0, %v1414_v32  ;;  %v2844_v19 = vpop.permute.xlu1 %938  ;;  %v1432_v24 = vsub.f32 0.0, %v1416_v58 }
 0x253   :  { %1932 = vpow2.f32 %v1455_v42  ;;  %v1434_v11 = vsub.f32 0.0, %v1418_v23 }
 0x254   :  { %1203 = vperm.xlu0 %1800, %v1145_v22   ;;  %1934 = vpow2.f32 %v1459_v49  ;;  %v1471_v22 = vmul.f32 1.442695, %v1447_v53  ;;  %v1465_v12 = vmul.f32 1.442695, %v1444_v27  ;;  %v1448_v10 = vmul.f32 2.0, %v1432_v24 }
 0x255   :  { %v2826_v20 = vpop.permute.xlu0 %920  ;;  %1936 = vpow2.f32 %v1463_v54 }
 0x256   :  { %1938 = vpow2.f32 %v1457_v50  ;;  %v2863_v37 = vpop.permute.xlu1 %926 }
 0x257   :  { %1940 = vpow2.f32 %v1467_v7  ;;  %v1438_v7 = vsub.f32 0.0, %v2750_v2 }
 0x258   :  { %1208 = vperm.xlu0 %1800, %v1146_v57   ;;  %1942 = vpow2.f32 %v1461_v45 }
 0x259   :  { %v2840_v42 = vpop.permute.xlu0 %936  ;;  %1944 = vpow2.f32 %v1471_v22 }
 0x25a   :  { %1946 = vpow2.f32 %v1465_v12  ;;  %v2871_v41 = vpop.permute.xlu1 %942 }
 0x25d   :  { %v1927_v62 = vpop.eup %1926  ;;  %v2853_v57 = vpop.permute.xlu0 %924 }
 0x25e   :  { %v1929_v39 = vpop.eup %1928  ;;  %v803_v28 = vmul.f32 0.6931472, %v1927_v62  ;;  %v1446_v62 = vmul.f32 2.0, %v1430_v61  ;;  %v1454_v61 = vmul.f32 2.0, %v1438_v7  ;;  %v2879_v22 = vpop.permute.xlu1 %930  ;;  %v2924_v7 = vld [vmem:[%s3395_s3 + $0x30] sm:$0xff] }
 0x25f   :  { %v1147_v63 = vmul.f32 2.0, %v1929_v39  ;;  %v1931_v36 = vpop.eup %1930 }
 0x260   :  { %v900_v29 = vmul.f32 %v2676_v15, %v803_v28  ;;  %v1419_v15 = vmul.f32 %v1929_v39, %v2728_v9  ;;  %v1149_v18 = vmul.f32 2.0, %v1931_v36  ;;  %v1421_v9 = vmul.f32 %v1931_v36, %v2802_v51  ;;  %v1933_v49 = vpop.eup %1932  ;;  %v3508_v36 = vld [vmem:[#allocation64_spill] sm:$0xff] }
 0x261   :  { %1213 = vperm.xlu0 %1800, %v1147_v63   ;;  %v1475_v51 = vmul.f32 1.442695, %v1449_v26  ;;  %v1935_v47 = vpop.eup %1934  ;;  %v1469_v28 = vmul.f32 1.442695, %v1446_v62  ;;  %v2866_v54 = vpop.permute.xlu0 %940  ;;  %v1450_v63 = vmul.f32 2.0, %v1434_v11  ;;  %v1436_v50 = vsub.f32 0.0, %v3508_v36 }
 0x262   :  { %1026 = vrot.lane.b32.xlu1 %v900_v29, %s2039_s16  ;;  %v1435_v33 = vsub.f32 0.0, %v1419_v15  ;;  %v1437_v3 = vsub.f32 0.0, %v1421_v9  ;;  %v1937_v59 = vpop.eup %1936  ;;  %v1473_v29 = vmul.f32 1.442695, %v1448_v10  ;;  %v3509_v9 = vld [vmem:[#allocation6_spill] sm:$0xff]  ;;  %v2888_v62 = vpop.permute.xlu1 %946 }
 0x263   :  { %1948 = vpow2.f32 %v1475_v51  ;;  %v1939_v5 = vpop.eup %1938  ;;  %v1477_v31 = vmul.f32 1.442695, %v1450_v63  ;;  %v1452_v15 = vmul.f32 2.0, %v1436_v50  ;;  %v1485_v23 = vmul.f32 1.442695, %v1454_v61  ;;  %v3512_v63 = vld [vmem:[#allocation48_spill] sm:$0xff] }
 0x264   :  { %v1451_v39 = vmul.f32 2.0, %v1435_v33  ;;  %v1453_v0 = vmul.f32 2.0, %v1437_v3  ;;  %1950 = vpow2.f32 %v1469_v28  ;;  %v1941_v53 = vpop.eup %1940  ;;  %v3513_v61 = vld [vmem:[#allocation5_spill] sm:$0xff] }
 0x265   :  { %1223 = vperm.xlu0 %1800, %v1149_v18   ;;  %v2875_v58 = vpop.permute.xlu0 %928  ;;  %v1943_v18 = vpop.eup %1942  ;;  %v1481_v27 = vmul.f32 1.442695, %v1452_v15 }
 0x266   :  { %1291 = vperm.xlu1 %1803, %v2837_v34   ;;  %v1483_v32 = vmul.f32 1.442695, %v1453_v0  ;;  %v1945_v45 = vpop.eup %1944 }
 0x267   :  { %v1947_v26 = vpop.eup %1946 }
 0x269   :  { %1802 = vset.pattern.permute.xlu0 %v3507_v56  ;;  %v1479_v56 = vmul.f32 1.442695, %v1451_v39  ;;  %v2882_v33 = vpop.permute.xlu0 %944  ;;  %v2894_v39 = vld [vmem:[%s3394_s2] sm:$0xff] }
 0x26a   :  { %1503 = vrot.lane.b32.xlu1 %v1933_v49, %s2039_s16  ;;  %1281 = vperm.xlu0 %1802, %v2850_v43   ;;  %v3510_v49 = vld [vmem:[#allocation47_spill] sm:$0xff] }
 0x26b   :  { %1952 = vpow2.f32 %v1479_v56  ;;  %v630_v24 = vsub.f32 %v3510_v49, %v3509_v9  ;;  %v2935_v49 = vld [vmem:[%s3395_s3 + $0x28] sm:$0xff] }
 0x26c   :  { %1954 = vpow2.f32 %v1473_v29  ;;  %v3511_v29 = vld [vmem:[#allocation8_spill] sm:$0xff] }
 0x26d   :  { %1956 = vpow2.f32 %v1483_v32  ;;  %v646_v3 = vmul.f32 %v2894_v39, %v630_v24  ;;  %v631_v36 = vsub.f32 %v3512_v63, %v3511_v29  ;;  %v2940_v24 = vld [vmem:[%s3395_s3 + $0x40] sm:$0xff]  ;;  %v2970_v29 = vld [vmem:[%s3394_s2 + $0x18] sm:$0xff] }
 0x26e   :  { %1507 = vrot.lane.b32.xlu1 %v1935_v47, %s2039_s16  ;;  %1296 = vperm.xlu0 %1802, %v2861_v13   ;;  %1958 = vpow2.f32 %v1477_v31  ;;  %v2897_v47 = vpop.permute.xlu0 %932  ;;  %v2918_v31 = vld [vmem:[%s3394_s2 + $0x8] sm:$0xff] }
 0x26f   :  { %1960 = vpow2.f32 %v1481_v27  ;;  %v966_v11 = vadd.f32 %v2815_v60, %v646_v3  ;;  %v647_v15 = vmul.f32 %v2918_v31, %v631_v36  ;;  %v2950_v3 = vld [vmem:[%s3394_s2 + $0x10] sm:$0xff] }
 0x270   :  { %v1949_v2 = vpop.eup %1948  ;;  %1962 = vpow2.f32 %v1485_v23  ;;  %v3516_v23 = vld [vmem:[#allocation50_spill] sm:$0xff] }
 0x271   :  { %v1951_v12 = vpop.eup %1950 }
 0x272   :  { %1511 = vrot.lane.b32.xlu1 %v1937_v59, %s2039_s16  ;;  %1505 = vrot.lane.b32.xlu0 %v1939_v5, %s2039_s16  ;;  %v2908_v5 = vld [vmem:[%s3395_s3 + $0x20] sm:$0xff]  ;;  %v2910_v32 = vpop.permute.xlu0 %948 }
 0x276   :  { %1515 = vrot.lane.b32.xlu1 %v1941_v53, %s2039_s16  ;;  %1509 = vrot.lane.b32.xlu0 %v1943_v18, %s2039_s16 }
 0x278   :  { %v1953_v51 = vpop.eup %1952 }
 0x279   :  { %v1955_v10 = vpop.eup %1954 }
 0x27a   :  { %1519 = vrot.lane.b32.xlu1 %v1945_v45, %s2039_s16  ;;  %1513 = vrot.lane.b32.xlu0 %v1947_v26, %s2039_s16  ;;  %v1957_v56 = vpop.eup %1956  ;;  %v967_v45 = vadd.f32 %v2826_v20, %v647_v15  ;;  %v3514_v26 = vld [vmem:[#allocation51_spill] sm:$0xff] }
 0x27b   :  { %v1959_v59 = vpop.eup %1958  ;;  %v3515_v20 = vld [vmem:[#allocation7_spill] sm:$0xff] }
 0x27c   :  { %v1961_v53 = vpop.eup %1960  ;;  %v1001_v18 = vpop.permute.xlu0 %1000 }
 0x27d   :  { %v1963_v27 = vpop.eup %1962  ;;  %v1047_v9 = vadd.f32 %v1001_v18, %v967_v45 }
 0x27e   :  { %1523 = vrot.lane.b32.xlu1 %v1949_v2, %s2039_s16  ;;  %1517 = vrot.lane.b32.xlu0 %v1951_v12, %s2039_s16  ;;  %v999_v28 = vpop.permute.xlu1 %998  ;;  %v632_v2 = vsub.f32 %v3514_v26, %v3513_v61  ;;  %v633_v12 = vsub.f32 %v3516_v23, %v3515_v20  ;;  %v2982_v26 = vld [vmem:[%s3395_s3 + $0x48] sm:$0xff] }
 0x27f   :  { %v1046_v0 = vadd.f32 %v999_v28, %v966_v11  ;;  %v1063_v11 = vsub.f32 0.0, %v1047_v9  ;;  %v2956_v28 = vld [vmem:[%s3395_s3 + $0x50] sm:$0xff] }
 0x280   :  { %v649_v63 = vmul.f32 %v2970_v29, %v633_v12 }
 0x281   :  { %v1062_v50 = vsub.f32 0.0, %v1046_v0 }
 0x282   :  { %1527 = vrot.lane.b32.xlu1 %v1953_v51, %s2039_s16  ;;  %1521 = vrot.lane.b32.xlu0 %v1955_v10, %s2039_s16  ;;  %v648_v10 = vmul.f32 %v2950_v3, %v632_v2 }
 0x283   :  { %v1078_v60 = vmul.f32 %v1062_v50, %v2850_v43  ;;  %v1079_v50 = vmul.f32 %v1063_v11, %v2792_v17  ;;  %v3518_v11 = vld [vmem:[#allocation53_spill] sm:$0xff] }
 0x285   :  { %v1095_v15 = vsel %vm1094_vm5, %v1078_v60, 0.0  ;;  %v1096_v61 = vsel %vm1094_vm5, %v1079_v50, 0.0  ;;  %v2990_v60 = vld [vmem:[%s3395_s3 + $0x58] sm:$0xff] }
 0x286   :  { %1531 = vrot.lane.b32.xlu1 %v1957_v56, %s2039_s16  ;;  %1525 = vrot.lane.b32.xlu0 %v1959_v59, %s2039_s16  ;;  %v968_v56 = vadd.f32 %v2831_v8, %v648_v10  ;;  %v2965_v59 = vld [vmem:[%s3395_s3 + $0x38] sm:$0xff]  ;;  %v1097_v9 = vadd.f32 %v1096_v61, %v1095_v15  ;;  %v3517_v10 = vld [vmem:[#allocation10_spill] sm:$0xff]  ;;  %v3004_v15 = vld [vmem:[%s3395_s3 + $0x68] sm:$0xff] }
 0x287   :  { %v3520_v61 = vld [vmem:[#allocation9_spill] sm:$0xff] }
 0x28a   :  { %1301 = vperm.xlu1 %1803, %v2908_v5   ;;  %1529 = vrot.lane.b32.xlu0 %v1961_v53, %s2039_s16  ;;  %v969_v53 = vadd.f32 %v2853_v57, %v649_v63 }
 0x28c   :  { %v2944_v51 = vpop.permute.xlu1 %1014 }
 0x28e   :  { %1311 = vperm.xlu1 %1803, %v2924_v7   ;;  %1533 = vrot.lane.b32.xlu0 %v1963_v27, %s2039_s16  ;;  %v2960_v0 = vpop.permute.xlu0 %1016 }
 0x290   :  { %v1003_v36 = vpop.permute.xlu1 %1002 }
 0x291   :  { %v1048_v8 = vadd.f32 %v1003_v36, %v968_v56  ;;  %v634_v56 = vsub.f32 %v3518_v11, %v3517_v10 }
 0x292   :  { %1321 = vperm.xlu1 %1803, %v2940_v24   ;;  %1306 = vperm.xlu0 %1802, %v2935_v49   ;;  %v1005_v18 = vpop.permute.xlu0 %1004 }
 0x293   :  { %v1064_v45 = vsub.f32 0.0, %v1048_v8  ;;  %v1049_v27 = vadd.f32 %v1005_v18, %v969_v53  ;;  %v3009_v18 = vld [vmem:[%s3394_s2 + $0x20] sm:$0xff] }
 0x294   :  { %v2994_v12 = vpop.permute.xlu1 %1018  ;;  %3519 = vst [vmem:[#allocation64_spill] sm:$0xff] %v3009_v18 }
 0x295   :  { %v1080_v2 = vmul.f32 %v1064_v45, %v2837_v34  ;;  %v1065_v20 = vsub.f32 0.0, %v1049_v27  ;;  %v650_v45 = vmul.f32 %v3009_v18, %v634_v56  ;;  %v3028_v56 = vld [vmem:[%s3394_s2 + $0x28] sm:$0xff] }
 0x296   :  { %1331 = vperm.xlu1 %1803, %v2956_v28   ;;  %1316 = vperm.xlu0 %1802, %v2965_v59   ;;  %v2992_v23 = vpop.permute.xlu0 %1020 }
 0x297   :  { %v1098_v57 = vsel %vm1094_vm5, %v1080_v2, 0.0  ;;  %v1081_v63 = vmul.f32 %v1065_v20, %v2861_v13  ;;  %v3521_v2 = vld [vmem:[#allocation52_spill] sm:$0xff]  ;;  %v970_v20 = vadd.f32 %v2863_v37, %v650_v45  ;;  %v3524_v45 = vld [vmem:[#allocation14_spill] sm:$0xff] }
 0x298   :  { %v1099_v36 = vadd.f32 %v1098_v57, %v1097_v9  ;;  %v1007_v27 = vpop.permute.xlu1 %1006  ;;  %v635_v9 = vsub.f32 %v3521_v2, %v3520_v61  ;;  %v3019_v57 = vld [vmem:[%s3395_s3 + $0x78] sm:$0xff]  ;;  %v3525_v61 = vld [vmem:[#allocation57_spill] sm:$0xff] }
 0x299   :  { %v1100_v50 = vsel %vm1094_vm5, %v1081_v63, 0.0  ;;  %v1050_v10 = vadd.f32 %v1007_v27, %v970_v20  ;;  %v3522_v63 = vld [vmem:[#allocation11_spill] sm:$0xff]  ;;  %v638_v2 = vsub.f32 %v3525_v61, %v3524_v45  ;;  %v3526_v20 = vld [vmem:[#allocation13_spill] sm:$0xff] }
 0x29a   :  { %1326 = vperm.xlu0 %1802, %v2982_v26   ;;  %v1009_v8 = vpop.permute.xlu0 %1008  ;;  %v1101_v53 = vadd.f32 %v1100_v50, %v1099_v36  ;;  %v3523_v36 = vld [vmem:[#allocation54_spill] sm:$0xff]  ;;  %v651_v37 = vmul.f32 %v3028_v56, %v635_v9  ;;  %v639_v1 = vsub.f32 %v3527_v35, %v3526_v20  ;;  %v3044_v9 = vld [vmem:[%s3394_s2 + $0x38] sm:$0xff]  ;;  %v3052_v35 = vld [vmem:[%s3394_s2 + $0x40] sm:$0xff] }
 0x29b   :  { %v637_v50 = vsub.f32 %v3523_v36, %v3522_v63  ;;  %v1066_v27 = vsub.f32 0.0, %v1050_v10  ;;  %v3528_v63 = vld [vmem:[#allocation37_spill] sm:$0xff]  ;;  %v3531_v10 = vld [vmem:[#allocation16_spill] sm:$0xff]  ;;  %3533 = vst [vmem:[#allocation6_spill] sm:$0xff] %v3052_v35  ;;  %v3534_v20 = vld [vmem:[#allocation15_spill] sm:$0xff] }
 0x29c   :  { %v971_v16 = vadd.f32 %v2875_v58, %v651_v37  ;;  %v1232_v36 = vmul.f32 %v3528_v63, %v2796_v4  ;;  %v1023_v52 = vpop.permute.xlu1 %1022  ;;  %v3532_v37 = vld [vmem:[#allocation59_spill] sm:$0xff]  ;;  %v654_v4 = vmul.f32 %v3052_v35, %v638_v2  ;;  %v3535_v63 = vld [vmem:[#allocation58_spill] sm:$0xff] }
 0x29d   :  { %v653_v45 = vmul.f32 %v3044_v9, %v637_v50  ;;  %v640_v18 = vsub.f32 %v3532_v37, %v3531_v10  ;;  %v1082_v30 = vmul.f32 %v1066_v27, %v2908_v5  ;;  %v641_v21 = vsub.f32 %v3535_v63, %v3534_v20  ;;  %v3538_v20 = vld [vmem:[#allocation61_spill] sm:$0xff] }
 0x29e   :  { %1336 = vperm.xlu0 %1802, %v2990_v60   ;;  %v3021_v11 = vpop.permute.xlu0 %1024  ;;  %v1051_v61 = vadd.f32 %v1009_v8, %v971_v16  ;;  %v1249_v50 = vmul.f32 1.442695, %v1232_v36  ;;  %v3062_v16 = vld [vmem:[%s3394_s2 + $0x48] sm:$0xff]  ;;  %v974_v37 = vadd.f32 %v2823_v6, %v654_v4 }
 0x29f   :  { %v973_v14 = vadd.f32 %v2897_v47, %v653_v45  ;;  %3536 = vst [vmem:[#allocation47_spill] sm:$0xff] %v3062_v16  ;;  %v655_v8 = vmul.f32 %v3062_v16, %v639_v1  ;;  %v3071_v47 = vld [vmem:[%s3394_s2 + $0x30] sm:$0xff] }
 0x2a0   :  { %v652_v2 = vmul.f32 %v3071_v47, %v636_v55  ;;  %v1067_v27 = vsub.f32 0.0, %v1051_v61  ;;  %v3537_v45 = vld [vmem:[#allocation18_spill] sm:$0xff]  ;;  %v1054_v16 = vadd.f32 %v2944_v51, %v974_v37  ;;  %v1102_v55 = vsel %vm1094_vm5, %v1082_v30, 0.0  ;;  %v3539_v61 = vld [vmem:[#allocation17_spill] sm:$0xff] }
 0x2a1   :  { %v642_v63 = vsub.f32 %v3538_v20, %v3537_v45  ;;  %v975_v35 = vadd.f32 %v2840_v42, %v655_v8  ;;  %v3080_v1 = vld [vmem:[%s3394_s2 + $0x50] sm:$0xff]  ;;  %1964 = vpow2.f32 %v1249_v50  ;;  %v3091_v42 = vld [vmem:[%s3394_s2 + $0x58] sm:$0xff]  ;;  %v3100_v50 = vld [vmem:[%s3394_s2 + $0x60] sm:$0xff]  ;;  %v1103_v20 = vadd.f32 %v1102_v55, %v1101_v53 }
 0x2a2   :  { %1346 = vperm.xlu0 %1802, %v3004_v15   ;;  %v1013_v58 = vpop.permute.xlu0 %1012  ;;  %v656_v6 = vmul.f32 %v3080_v1, %v640_v18  ;;  %v972_v4 = vadd.f32 %v2879_v22, %v652_v2  ;;  %v657_v8 = vmul.f32 %v3091_v42, %v641_v21  ;;  %v1083_v51 = vmul.f32 %v1067_v27, %v2935_v49  ;;  %v3109_v27 = vld [vmem:[%s3394_s2 + $0x68] sm:$0xff] }
 0x2a3   :  { %v1053_v36 = vadd.f32 %v1013_v58, %v973_v14  ;;  %v3540_v58 = vld [vmem:[#allocation60_spill] sm:$0xff]  ;;  %v1055_v45 = vadd.f32 %v2960_v0, %v975_v35  ;;  %v658_v2 = vmul.f32 %v3100_v50, %v642_v63  ;;  %v1070_v21 = vsub.f32 0.0, %v1054_v16 }
 0x2a4   :  { %v643_v14 = vsub.f32 %v3540_v58, %v3539_v61  ;;  %v976_v22 = vadd.f32 %v2844_v19, %v656_v6  ;;  %v977_v61 = vadd.f32 %v2866_v54, %v657_v8  ;;  %v1104_v54 = vsel %vm1094_vm5, %v1083_v51, 0.0 }
 0x2a5   :  { %v1069_v37 = vsub.f32 0.0, %v1053_v36  ;;  %v978_v19 = vadd.f32 %v2871_v41, %v658_v2  ;;  %v1071_v6 = vsub.f32 0.0, %v1055_v45  ;;  %v1105_v63 = vadd.f32 %v1104_v54, %v1103_v20 }
 0x2a6   :  { %1356 = vperm.xlu0 %1802, %v3019_v57   ;;  %v1056_v0 = vadd.f32 %v2994_v12, %v976_v22  ;;  %v659_v36 = vmul.f32 %v3109_v27, %v643_v14  ;;  %v1057_v53 = vadd.f32 %v2992_v23, %v977_v61  ;;  %v1086_v55 = vmul.f32 %v1070_v21, %v2940_v24 }
 0x2a7   :  { %v1085_v12 = vmul.f32 %v1069_v37, %v2965_v59  ;;  %v1087_v23 = vmul.f32 %v1071_v6, %v2982_v26 }
 0x2a8   :  { %v979_v41 = vadd.f32 %v2882_v33, %v659_v36  ;;  %v1072_v8 = vsub.f32 0.0, %v1056_v0  ;;  %v1073_v51 = vsub.f32 0.0, %v1057_v53  ;;  %v1110_v33 = vsel %vm1094_vm5, %v1086_v55, 0.0  ;;  %v3133_v0 = vld [vmem:[%s3395_s3 + $0x60] sm:$0xff] }
 0x2a9   :  { %v3065_v10 = vpop.permute.xlu1 %1193  ;;  %v1108_v2 = vsel %vm1094_vm5, %v1085_v12, 0.0  ;;  %v1112_v36 = vsel %vm1094_vm5, %v1087_v23, 0.0 }
 0x2aa   :  { %v1059_v37 = vadd.f32 %v3021_v11, %v979_v41  ;;  %v1088_v20 = vmul.f32 %v1072_v8, %v2956_v28  ;;  %v1089_v11 = vmul.f32 %v1073_v51, %v2990_v60 }
 0x2ac   :  { %v1075_v6 = vsub.f32 0.0, %v1059_v37  ;;  %v1116_v8 = vsel %vm1094_vm5, %v1089_v11, 0.0 }
 0x2ad   :  { %v1011_v18 = vpop.permute.xlu1 %1010 }
 0x2ae   :  { %v1052_v30 = vadd.f32 %v1011_v18, %v972_v4  ;;  %v1058_v18 = vadd.f32 %v1023_v52, %v978_v19  ;;  %v1965_v19 = vpop.eup %1964 }
 0x2af   :  { %v1164_v35 = vpop.permute.xlu0 %1163 }
 0x2b0   :  { %v1068_v58 = vsub.f32 0.0, %v1052_v30  ;;  %v1074_v21 = vsub.f32 0.0, %v1058_v18  ;;  %v1091_v18 = vmul.f32 %v1075_v6, %v3004_v15  ;;  %v3157_v6 = vld [vmem:[%s3394_s2 + $0x78] sm:$0xff] }
 0x2b1   :  { %v3112_v4 = vpop.permute.xlu1 %1218 }
 0x2b2   :  { %v1084_v16 = vmul.f32 %v1068_v58, %v2924_v7  ;;  %v1090_v41 = vmul.f32 %v1074_v21, %v3133_v0  ;;  %v1120_v37 = vsel %vm1094_vm5, %v1091_v18, 0.0 }
 0x2b3   :  { %v1169_v45 = vpop.permute.xlu0 %1168 }
 0x2b4   :  { %v1106_v14 = vsel %vm1094_vm5, %v1084_v16, 0.0  ;;  %v1114_v16 = vsel %vm1094_vm5, %v1088_v20, 0.0 }
 0x2b5   :  { %v1107_v22 = vadd.f32 %v1106_v14, %v1105_v63  ;;  %v3121_v30 = vpop.permute.xlu1 %1228 }
 0x2b7   :  { %v1109_v61 = vadd.f32 %v1108_v2, %v1107_v22  ;;  %v3128_v52 = vpop.permute.xlu0 %1173  ;;  %v1118_v22 = vsel %vm1094_vm5, %v1090_v41, 0.0  ;;  %v3541_v2 = vld [vmem:[#allocation19_spill] sm:$0xff]  ;;  %v3166_v41 = vld [vmem:[%s3394_s2 + $0x70] sm:$0xff] }
 0x2b9   :  { %v1111_v58 = vadd.f32 %v1110_v33, %v1109_v61  ;;  %v3542_v61 = vld [vmem:[#allocation62_spill] sm:$0xff] }
 0x2ba   :  { %v1287_v53 = vpop.permute.xlu1 %1286  ;;  %v645_v33 = vsub.f32 %v3542_v61, %v3541_v2  ;;  %v1234_v2 = vmul.f32 %v2509_v40, %v1169_v45 }
 0x2bb   :  { %v1113_v54 = vadd.f32 %v1112_v36, %v1111_v58  ;;  %v1360_v12 = vmul.f32 %v1965_v19, %v1287_v53  ;;  %v1029_v63 = vpop.permute.xlu0 %1028  ;;  %v1233_v58 = vmul.f32 %v1164_v35, %v2515_v46  ;;  %v3543_v19 = vld [vmem:[#allocation20_spill] sm:$0xff]  ;;  %v3544_v36 = vld [vmem:[#allocation63_spill] sm:$0xff] }
 0x2bc   :  { %v644_v11 = vsub.f32 %v3544_v36, %v3543_v19  ;;  %v661_v53 = vmul.f32 %v3157_v6, %v645_v33 }
 0x2bd   :  { %1376 = vst.msk [vmem:[%s3396_s4 + $0x8] sm:$0xff] %vm192_vm0, %v1360_v12  ;;  %v1115_v55 = vadd.f32 %v1114_v16, %v1113_v54  ;;  %v1251_v16 = vmul.f32 1.442695, %v1233_v58 }
 0x2be   :  { %v981_v12 = vadd.f32 %v2910_v32, %v661_v53  ;;  %v660_v46 = vmul.f32 %v3166_v41, %v644_v11 }
 0x2bf   :  { %v1117_v14 = vadd.f32 %v1116_v8, %v1115_v55  ;;  %v3146_v23 = vpop.permute.xlu0 %1178  ;;  %v3545_v55 = vld [vmem:[#allocation38_spill] sm:$0xff]  ;;  %1966 = vpow2.f32 %v1251_v16 }
 0x2c0   :  { %v1061_v35 = vadd.f32 %v1029_v63, %v981_v12  ;;  %v1231_v8 = vmul.f32 %v2818_v38, %v3545_v55  ;;  %v3180_v63 = vld [vmem:[%s3395_s3 + $0x70] sm:$0xff] }
 0x2c1   :  { %v1119_v51 = vadd.f32 %v1118_v22, %v1117_v14  ;;  %v980_v14 = vadd.f32 %v2888_v62, %v660_v46  ;;  %v1253_v62 = vmul.f32 1.442695, %v1234_v2  ;;  %v1392_v2 = vmul.f32 %v2918_v31, %v2792_v17 }
 0x2c2   :  { %v1391_v17 = vmul.f32 %v2894_v39, %v2850_v43  ;;  %v1398_v43 = vmul.f32 %v3044_v9, %v2965_v59  ;;  %v1239_v39 = vmul.f32 %v3065_v10, %v2517_v48  ;;  %v3549_v48 = vld [vmem:[#allocation42_spill] sm:$0xff] }
 0x2c3   :  { %v1121_v20 = vadd.f32 %v1120_v37, %v1119_v51  ;;  %v1184_v21 = vpop.permute.xlu0 %1183  ;;  %v1077_v51 = vsub.f32 0.0, %v1061_v35  ;;  %v1247_v37 = vmul.f32 1.442695, %v1231_v8 }
 0x2c4   :  { %v1263_v9 = vmul.f32 1.442695, %v1239_v39  ;;  %v1403_v39 = vmul.f32 %v3100_v50, %v3133_v0  ;;  %v1405_v50 = vmul.f32 %v3166_v41, %v3180_v63 }
 0x2c5   :  { %v1093_v38 = vmul.f32 %v1077_v51, %v3019_v57  ;;  %1968 = vpow2.f32 %v1247_v37 }
 0x2c6   :  { %1970 = vpow2.f32 %v1253_v62 }
 0x2c7   :  { %v3160_v54 = vpop.permute.xlu0 %1188  ;;  %v1124_v40 = vsel %vm1094_vm5, %v1093_v38, 0.0 }
 0x2cb   :  { %v3171_v18 = vpop.permute.xlu0 %1198 }
 0x2cc   :  { %v1967_v12 = vpop.eup %1966 }
 0x2cf   :  { %v3175_v61 = vpop.permute.xlu0 %1203 }
 0x2d0   :  { %v1241_v10 = vmul.f32 %v3175_v61, %v3549_v48 }
 0x2d2   :  { %v1969_v8 = vpop.eup %1968 }
 0x2d3   :  { %v3184_v19 = vpop.permute.xlu0 %1208  ;;  %v1971_v51 = vpop.eup %1970 }
 0x2d4   :  { %v1027_v22 = vpop.permute.xlu1 %1026 }
 0x2d5   :  { %v1060_v32 = vadd.f32 %v1027_v22, %v980_v14 }
 0x2d7   :  { %v1076_v33 = vsub.f32 0.0, %v1060_v32 }
 0x2d9   :  { %v1092_v58 = vmul.f32 %v1076_v33, %v3180_v63 }
 0x2db   :  { %v1122_v36 = vsel %vm1094_vm5, %v1092_v58, 0.0  ;;  %v1235_v58 = vmul.f32 %v3128_v52, %v2539_v25 }
 0x2dc   :  { %v1123_v11 = vadd.f32 %v1122_v36, %v1121_v20  ;;  %v3188_v45 = vpop.permute.xlu0 %1213  ;;  %v1394_v36 = vmul.f32 %v2970_v29, %v2861_v13  ;;  %v1393_v29 = vmul.f32 %v2950_v3, %v2837_v34 }
 0x2de   :  { %v1125_v53 = vadd.f32 %v1124_v40, %v1123_v11  ;;  %v1255_v40 = vmul.f32 1.442695, %v1235_v58  ;;  %v1402_v58 = vmul.f32 %v3091_v42, %v2990_v60 }
 0x2e0   :  { %1126 = vadd.xlane.f32.xlu1 %v1125_v53  ;;  %v3190_v46 = vpop.permute.xlu0 %1223  ;;  %v1237_v53 = vmul.f32 %v1184_v21, %v2559_v44  ;;  %1972 = vpow2.f32 %v1255_v40  ;;  %v1404_v40 = vmul.f32 %v3109_v27, %v3004_v15 }
 0x2e1   :  { %v1292_v16 = vpop.permute.xlu1 %1291 }
 0x2e2   :  { %v1361_v35 = vmul.f32 %v1967_v12, %v1292_v16  ;;  %v1396_v16 = vmul.f32 %v3028_v56, %v2935_v49  ;;  %v1259_v44 = vmul.f32 1.442695, %v1237_v53  ;;  %v3546_v49 = vld [vmem:[#allocation41_spill] sm:$0xff] }
 0x2e3   :  { %v1236_v56 = vmul.f32 %v3546_v49, %v3146_v23  ;;  %v3550_v23 = vld [vmem:[#allocation44_spill] sm:$0xff] }
 0x2e4   :  { %1377 = vst.msk [vmem:[%s3396_s4 + $0x10] sm:$0xff] %vm192_vm0, %v1361_v35  ;;  %1974 = vpow2.f32 %v1259_v44 }
 0x2e5   :  { %v1504_v55 = vpop.permute.xlu1 %1503  ;;  %v1282_v20 = vpop.permute.xlu0 %1281  ;;  %1976 = vpow2.f32 %v1263_v9 }
 0x2e6   :  { %v1359_v14 = vmul.f32 %v1969_v8, %v1282_v20  ;;  %v1551_v13 = vmul.f32 %v1504_v55, %v1391_v17  ;;  %v3547_v8 = vld [vmem:[#allocation64_spill] sm:$0xff]  ;;  %v3548_v20 = vld [vmem:[#allocation47_spill] sm:$0xff] }
 0x2e7   :  { %v1395_v34 = vmul.f32 %v3547_v8, %v2908_v5  ;;  %v1400_v59 = vmul.f32 %v3548_v20, %v2982_v26  ;;  %v1397_v5 = vmul.f32 %v3071_v47, %v2924_v7  ;;  %v1267_v26 = vmul.f32 1.442695, %v1241_v10 }
 0x2e8   :  { %1375 = vst.msk [vmem:[%s3396_s4] sm:$0xff] %vm192_vm0, %v1359_v14 }
 0x2e9   :  { %v1508_v22 = vpop.permute.xlu1 %1507  ;;  %v1297_v32 = vpop.permute.xlu0 %1296 }
 0x2ea   :  { %v1362_v37 = vmul.f32 %v1971_v51, %v1297_v32  ;;  %v1553_v55 = vmul.f32 %v1508_v22, %v1393_v29  ;;  %v1257_v32 = vmul.f32 1.442695, %v1236_v56 }
 0x2ec   :  { %1378 = vst.msk [vmem:[%s3396_s4 + $0x18] sm:$0xff] %vm192_vm0, %v1362_v37  ;;  %v1238_v37 = vmul.f32 %v3550_v23, %v3160_v54  ;;  %1978 = vpow2.f32 %v1257_v32 }
 0x2ed   :  { %v1512_v33 = vpop.permute.xlu1 %1511  ;;  %v1506_v38 = vpop.permute.xlu0 %1505  ;;  %1980 = vpow2.f32 %v1267_v26 }
 0x2ee   :  { %v1552_v62 = vmul.f32 %v1506_v38, %v1392_v2  ;;  %v1555_v22 = vmul.f32 %v1512_v33, %v1395_v34  ;;  %v3552_v33 = vld [vmem:[#allocation6_spill] sm:$0xff]  ;;  %v1973_v53 = vpop.eup %1972 }
 0x2f0   :  { %1574 = vperm.xlu0 %1802, %v1552_v62   ;;  %v1261_v62 = vmul.f32 1.442695, %v1238_v37 }
 0x2f1   :  { %v1516_v11 = vpop.permute.xlu1 %1515  ;;  %1341 = vperm.xlu1 %1803, %v3133_v0   ;;  %v1510_v31 = vpop.permute.xlu0 %1509 }
 0x2f2   :  { %v1554_v12 = vmul.f32 %v1510_v31, %v1394_v36  ;;  %v3551_v36 = vld [vmem:[#allocation39_spill] sm:$0xff]  ;;  %v1557_v54 = vmul.f32 %v1516_v11, %v1397_v5  ;;  %v1399_v31 = vmul.f32 %v3552_v33, %v2940_v24  ;;  %1982 = vpow2.f32 %v1261_v62  ;;  %v1975_v15 = vpop.eup %1974 }
 0x2f3   :  { %v1240_v17 = vmul.f32 %v3551_v36, %v3171_v18  ;;  %v1401_v24 = vmul.f32 %v3080_v1, %v2956_v28  ;;  %v1977_v44 = vpop.eup %1976 }
 0x2f4   :  { %1584 = vperm.xlu0 %1802, %v1554_v12   ;;  %v3553_v12 = vld [vmem:[#allocation40_spill] sm:$0xff] }
 0x2f5   :  { %v1520_v25 = vpop.permute.xlu1 %1519  ;;  %1351 = vperm.xlu1 %1803, %v3180_v63   ;;  %v1514_v52 = vpop.permute.xlu0 %1513  ;;  %v1265_v42 = vmul.f32 1.442695, %v1240_v17  ;;  %v3557_v17 = vld [vmem:[#allocation49_spill] sm:$0xff] }
 0x2f6   :  { %v1556_v21 = vmul.f32 %v1514_v52, %v1396_v16  ;;  %v1242_v16 = vmul.f32 %v3553_v12, %v3184_v19  ;;  %v1559_v11 = vmul.f32 %v1520_v25, %v1399_v31  ;;  %v1406_v52 = vmul.f32 %v3157_v6, %v3019_v57  ;;  %v3554_v19 = vld [vmem:[#allocation43_spill] sm:$0xff] }
 0x2f7   :  { %1984 = vpow2.f32 %v1265_v42  ;;  %v3558_v42 = vld [vmem:[#allocation21_spill] sm:$0xff] }
 0x2f8   :  { %1594 = vperm.xlu0 %1802, %v1556_v21   ;;  %v1269_v25 = vmul.f32 1.442695, %v1242_v16 }
 0x2f9   :  { %v1524_v35 = vpop.permute.xlu1 %1523  ;;  %1569 = vperm.xlu1 %1803, %v1551_v13   ;;  %v1518_v3 = vpop.permute.xlu0 %1517 }
 0x2fa   :  { %v1558_v14 = vmul.f32 %v1518_v3, %v1398_v43  ;;  %v1244_v43 = vmul.f32 %v3554_v19, %v3112_v4  ;;  %v1561_v1 = vmul.f32 %v1524_v35, %v1401_v24  ;;  %v3555_v4 = vld [vmem:[#allocation46_spill] sm:$0xff]  ;;  %1986 = vpow2.f32 %v1269_v25 }
 0x2fb   :  { %v1246_v56 = vmul.f32 %v3555_v4, %v3121_v30  ;;  %v3560_v25 = vld [vmem:[#allocation26_spill] sm:$0xff] }
 0x2fc   :  { %1604 = vperm.xlu0 %1802, %v1558_v14   ;;  %v1273_v49 = vmul.f32 1.442695, %v1244_v43 }
 0x2fd   :  { %v1528_v51 = vpop.permute.xlu1 %1527  ;;  %1579 = vperm.xlu1 %1803, %v1553_v55   ;;  %v1522_v2 = vpop.permute.xlu0 %1521  ;;  %v1277_v30 = vmul.f32 1.442695, %v1246_v56 }
 0x2fe   :  { %v1560_v38 = vmul.f32 %v1522_v2, %v1400_v59  ;;  %v1979_v55 = vpop.eup %1978  ;;  %v1563_v8 = vmul.f32 %v1528_v51, %v1403_v39  ;;  %1988 = vpow2.f32 %v1273_v49  ;;  %v3563_v49 = vld [vmem:[#allocation22_spill] sm:$0xff] }
 0x2ff   :  { %v1981_v3 = vpop.eup %1980  ;;  %1990 = vpow2.f32 %v1277_v30 }
 0x300   :  { %1614 = vperm.xlu0 %1802, %v1560_v38   ;;  %v1983_v9 = vpop.eup %1982 }
 0x301   :  { %v1532_v61 = vpop.permute.xlu1 %1531  ;;  %1589 = vperm.xlu1 %1803, %v1555_v22   ;;  %v1526_v7 = vpop.permute.xlu0 %1525 }
 0x302   :  { %v1562_v47 = vmul.f32 %v1526_v7, %v1402_v58  ;;  %v1565_v41 = vmul.f32 %v1532_v61, %v1405_v50  ;;  %v3556_v61 = vld [vmem:[#allocation45_spill] sm:$0xff] }
 0x303   :  { %v1243_v62 = vmul.f32 %v3188_v45, %v3556_v61  ;;  %v3565_v50 = vld [vmem:[#allocation25_spill] sm:$0xff] }
 0x304   :  { %1624 = vperm.xlu0 %1802, %v1562_v47   ;;  %v1985_v10 = vpop.eup %1984 }
 0x305   :  { %v1302_v60 = vpop.permute.xlu1 %1301  ;;  %1599 = vperm.xlu1 %1803, %v1557_v54   ;;  %v1530_v13 = vpop.permute.xlu0 %1529  ;;  %v1271_v36 = vmul.f32 1.442695, %v1243_v62  ;;  %v1245_v54 = vmul.f32 %v3190_v46, %v3557_v17  ;;  %v3573_v62 = vld [vmem:[#allocation36_spill] sm:$0xff] }
 0x306   :  { %v1363_v18 = vmul.f32 %v1973_v53, %v1302_v60  ;;  %v1564_v29 = vmul.f32 %v1530_v13, %v1404_v40  ;;  %v3559_v13 = vld [vmem:[#allocation24_spill] sm:$0xff] }
 0x307   :  { %v1987_v32 = vpop.eup %1986  ;;  %1992 = vpow2.f32 %v1271_v36  ;;  %v1275_v33 = vmul.f32 1.442695, %v1245_v54 }
 0x308   :  { %1379 = vst.msk [vmem:[%s3396_s4 + $0x20] sm:$0xff] %vm192_vm0, %v1363_v18  ;;  %1634 = vperm.xlu0 %1802, %v1564_v29  }
 0x309   :  { %v1312_v27 = vpop.permute.xlu1 %1311  ;;  %1609 = vperm.xlu1 %1803, %v1559_v11   ;;  %v1534_v57 = vpop.permute.xlu0 %1533  ;;  %1994 = vpow2.f32 %v1275_v33 }
 0x30a   :  { %v1365_v28 = vmul.f32 %v1975_v15, %v1312_v27  ;;  %v1566_v6 = vmul.f32 %v1534_v57, %v1406_v52 }
 0x30b   :  { %v1989_v22 = vpop.eup %1988 }
 0x30c   :  { %1381 = vst.msk [vmem:[%s3396_s4 + $0x30] sm:$0xff] %vm192_vm0, %v1365_v28  ;;  %1644 = vperm.xlu0 %1802, %v1566_v6   ;;  %v1991_v26 = vpop.eup %1990 }
 0x30d   :  { %v1322_v21 = vpop.permute.xlu1 %1321  ;;  %1619 = vperm.xlu1 %1803, %v1561_v1   ;;  %v1307_v0 = vpop.permute.xlu0 %1306  ;;  %v3561_v1 = vld [vmem:[#allocation23_spill] sm:$0xff] }
 0x30e   :  { %v1367_v35 = vmul.f32 %v1977_v44, %v1322_v21  ;;  %v1364_v34 = vmul.f32 %v1979_v55, %v1307_v0  ;;  %v3562_v44 = vld [vmem:[#allocation29_spill] sm:$0xff]  ;;  %v3564_v55 = vld [vmem:[#allocation28_spill] sm:$0xff] }
 0x310   :  { %1383 = vst.msk [vmem:[%s3396_s4 + $0x40] sm:$0xff] %vm192_vm0, %v1367_v35  ;;  %1380 = vst.msk [vmem:[%s3396_s4 + $0x28] sm:$0xff] %vm192_vm0, %v1364_v34 }
 0x311   :  { %v1332_v20 = vpop.permute.xlu1 %1331  ;;  %1629 = vperm.xlu1 %1803, %v1563_v8   ;;  %v1317_v63 = vpop.permute.xlu0 %1316 }
 0x312   :  { %v1369_v59 = vmul.f32 %v1981_v3, %v1332_v20  ;;  %v1366_v48 = vmul.f32 %v1983_v9, %v1317_v63  ;;  %v3566_v20 = vld [vmem:[#allocation30_spill] sm:$0xff] }
 0x314   :  { %1385 = vst.msk [vmem:[%s3396_s4 + $0x50] sm:$0xff] %vm192_vm0, %v1369_v59  ;;  %1382 = vst.msk [vmem:[%s3396_s4 + $0x38] sm:$0xff] %vm192_vm0, %v1366_v48  ;;  %v1993_v40 = vpop.eup %1992  ;;  %v3567_v59 = vld [vmem:[#allocation27_spill] sm:$0xff]  ;;  %v3568_v48 = vld [vmem:[#allocation32_spill] sm:$0xff] }
 0x315   :  { %1639 = vperm.xlu1 %1803, %v1565_v41   ;;  %v1327_v14 = vpop.permute.xlu0 %1326 }
 0x316   :  { %v1368_v51 = vmul.f32 %v1985_v10, %v1327_v14  ;;  %v1995_v46 = vpop.eup %1994  ;;  %v3569_v14 = vld [vmem:[#allocation31_spill] sm:$0xff] }
 0x318   :  { %1384 = vst.msk [vmem:[%s3396_s4 + $0x48] sm:$0xff] %vm192_vm0, %v1368_v51 }
 0x319   :  { %v1337_v23 = vpop.permute.xlu0 %1336 }
 0x31a   :  { %v1370_v37 = vmul.f32 %v1987_v32, %v1337_v23 }
 0x31c   :  { %1386 = vst.msk [vmem:[%s3396_s4 + $0x58] sm:$0xff] %vm192_vm0, %v1370_v37  ;;  %v3570_v37 = vld [vmem:[#allocation34_spill] sm:$0xff] }
 0x31d   :  { %v1347_v5 = vpop.permute.xlu0 %1346 }
 0x31e   :  { %v1372_v2 = vmul.f32 %v1989_v22, %v1347_v5  ;;  %v3571_v5 = vld [vmem:[#allocation33_spill] sm:$0xff] }
 0x320   :  { %1388 = vst.msk [vmem:[%s3396_s4 + $0x68] sm:$0xff] %vm192_vm0, %v1372_v2 }
 0x321   :  { %v1357_v38 = vpop.permute.xlu0 %1356 }
 0x322   :  { %v1374_v58 = vmul.f32 %v1991_v26, %v1357_v38  ;;  %v3572_v38 = vld [vmem:[#allocation35_spill] sm:$0xff] }
 0x324   :  { %1390 = vst.msk [vmem:[%s3396_s4 + $0x78] sm:$0xff] %vm192_vm0, %v1374_v58 }
 0x369   :  { %v1127_v31 = vpop.xlane.xlu1 %1126 }
 0x36a   :  { %v1128_v7 = vrot.slane %v1127_v31, 4 }
 0x36b   :  { %v1575_v53 = vpop.permute.xlu0 %1574 }
 0x36c   :  { %v1129_v47 = vadd.f32 %v1128_v7, %v1127_v31  ;;  %v1648_v12 = vmul.f32 %v3558_v42, %v1575_v53 }
 0x36d   :  { %v1342_v60 = vpop.permute.xlu1 %1341 }
 0x36e   :  { %v1130_v16 = vrot.slane %v1129_v47, 2  ;;  %v1371_v18 = vmul.f32 %v1993_v40, %v1342_v60  ;;  %1664 = vst.msk [vmem:[%s3397_s5 + $0x8] sm:$0xff] %vm192_vm0, %v1648_v12 }
 0x36f   :  { %v1585_v11 = vpop.permute.xlu0 %1584 }
 0x370   :  { %1387 = vst.msk [vmem:[%s3396_s4 + $0x60] sm:$0xff] %vm192_vm0, %v1371_v18  ;;  %v1131_v45 = vadd.f32 %v1130_v16, %v1129_v47  ;;  %v1650_v29 = vmul.f32 %v3559_v13, %v1585_v11 }
 0x371   :  { %v1352_v24 = vpop.permute.xlu1 %1351 }
 0x372   :  { %v1373_v52 = vmul.f32 %v1995_v46, %v1352_v24  ;;  %v1132_v15 = vrot.slane %v1131_v45, 1  ;;  %1666 = vst.msk [vmem:[%s3397_s5 + $0x18] sm:$0xff] %vm192_vm0, %v1650_v29 }
 0x373   :  { %v1595_v19 = vpop.permute.xlu0 %1594 }
 0x374   :  { %1389 = vst.msk [vmem:[%s3396_s4 + $0x70] sm:$0xff] %vm192_vm0, %v1373_v52  ;;  %v1133_v27 = vadd.f32 %v1132_v15, %v1131_v45  ;;  %v1652_v28 = vmul.f32 %v3560_v25, %v1595_v19 }
 0x375   :  { %v1570_v43 = vpop.permute.xlu1 %1569 }
 0x376   :  { %v1647_v39 = vmul.f32 %v3561_v1, %v1570_v43  ;;  %1789 = vpush %v1133_v27 }
 0x377   :  { %1668 = vst.msk [vmem:[%s3397_s5 + $0x28] sm:$0xff] %vm192_vm0, %v1652_v28  ;;  %v1605_v57 = vpop.permute.xlu0 %1604 }
 0x378   :  { %1663 = vst.msk [vmem:[%s3397_s5] sm:$0xff] %vm192_vm0, %v1647_v39  ;;  %v1654_v21 = vmul.f32 %v3562_v44, %v1605_v57 }
 0x379   :  { %v1580_v6 = vpop.permute.xlu1 %1579 }
 0x37a   :  { %v1649_v4 = vmul.f32 %v3563_v49, %v1580_v6  ;;  %1670 = vst.msk [vmem:[%s3397_s5 + $0x38] sm:$0xff] %vm192_vm0, %v1654_v21 }
 0x37b   :  { %v1615_v56 = vpop.permute.xlu0 %1614 }
 0x37c   :  { %1665 = vst.msk [vmem:[%s3397_s5 + $0x10] sm:$0xff] %vm192_vm0, %v1649_v4  ;;  %v1656_v8 = vmul.f32 %v3564_v55, %v1615_v56 }
 0x37d   :  { %v1590_v35 = vpop.permute.xlu1 %1589 }
 0x37e   :  { %v1651_v0 = vmul.f32 %v3565_v50, %v1590_v35  ;;  %1672 = vst.msk [vmem:[%s3397_s5 + $0x48] sm:$0xff] %vm192_vm0, %v1656_v8 }
 0x37f   :  { %v1625_v34 = vpop.permute.xlu0 %1624 }
 0x380   :  { %1667 = vst.msk [vmem:[%s3397_s5 + $0x20] sm:$0xff] %vm192_vm0, %v1651_v0  ;;  %v1658_v30 = vmul.f32 %v3566_v20, %v1625_v34 }
 0x381   :  { %v1600_v3 = vpop.permute.xlu1 %1599 }
 0x382   :  { %v1653_v9 = vmul.f32 %v3567_v59, %v1600_v3  ;;  %1674 = vst.msk [vmem:[%s3397_s5 + $0x58] sm:$0xff] %vm192_vm0, %v1658_v30 }
 0x383   :  { %v1635_v41 = vpop.permute.xlu0 %1634 }
 0x384   :  { %1669 = vst.msk [vmem:[%s3397_s5 + $0x30] sm:$0xff] %vm192_vm0, %v1653_v9  ;;  %v1660_v10 = vmul.f32 %v3568_v48, %v1635_v41 }
 0x385   :  { %v1610_v63 = vpop.permute.xlu1 %1609 }
 0x386   :  { %v1655_v51 = vmul.f32 %v3569_v14, %v1610_v63  ;;  %1676 = vst.msk [vmem:[%s3397_s5 + $0x68] sm:$0xff] %vm192_vm0, %v1660_v10 }
 0x387   :  { %v1645_v32 = vpop.permute.xlu0 %1644 }
 0x388   :  { %1671 = vst.msk [vmem:[%s3397_s5 + $0x40] sm:$0xff] %vm192_vm0, %v1655_v51  ;;  %v1662_v22 = vmul.f32 %v3570_v37, %v1645_v32 }
 0x389   :  { %v1620_v23 = vpop.permute.xlu1 %1619 }
 0x38a   :  { %v1657_v2 = vmul.f32 %v3571_v5, %v1620_v23  ;;  %1678 = vst.msk [vmem:[%s3397_s5 + $0x78] sm:$0xff] %vm192_vm0, %v1662_v22 }
 0x38c   :  { %1673 = vst.msk [vmem:[%s3397_s5 + $0x50] sm:$0xff] %vm192_vm0, %v1657_v2 }
 0x38d   :  { %v1630_v26 = vpop.permute.xlu1 %1629 }
 0x38e   :  { %v1659_v58 = vmul.f32 %v3572_v38, %v1630_v26 }
 0x390   :  { %1675 = vst.msk [vmem:[%s3397_s5 + $0x60] sm:$0xff] %vm192_vm0, %v1659_v58 }
 0x391   :  { %v1640_v61 = vpop.permute.xlu1 %1639 }
 0x392   :  { %v1661_v36 = vmul.f32 %v3573_v62, %v1640_v61 }
 0x394   :  { %1677 = vst.msk [vmem:[%s3397_s5 + $0x70] sm:$0xff] %vm192_vm0, %v1661_v36 }
 0x3a7   :  { %s1790_s11 = spop %1789 }
 0x3a8   :  { %v1679_v17 = vstv %s1790_s11 }
 0x3a9   :  { %1680 = vst [vmem:[#allocation2] sm:$0xff] %v1679_v17 }
 0x3aa   :  { %2023 = shalt.err (!%p2020_p4)
}
 0x3ab   :  { %1694 = dma.vmem_to_hbm [thread:$0]  %s1692_s1, 128, %s3398_s6, [#allocation3]  }
 0x3ac   :  { %2032 = dma.done.wait [#allocation3], 128  }
 0x3ad   :  { %2033 = vsyncadd [#allocation3], 4294967168 }
 0x3ae   :  { %1702 = vsyncpa [#allocation3], 1 }

</bundles_post_ra>
